<compile_context>
chip_gen: v7x
topology: tpu7x:2x2x1
jax: 0.10.0
libtpu: 0.0.40
codegen_flags: <defaults>
</compile_context>

<pallas_src>
import jax
import jax.numpy as jnp
import numpy as np
from jax.experimental import pallas as pl
from jax.experimental.pallas import tpu as pltpu


# ----------------------------- Pallas kernels ------------------------------ #

def _conv1_pool_relu_kernel(p_ref, w_ref, b_ref, o_ref):
    """conv1 (as one stacked matmul) + 2x2 max-pool + bias + ReLU for a batch tile.

    p_ref: (TB, 4, P, K)  im2col patches grouped by pool-window position
    w_ref: (K, C)         conv1 weight matrix (K = 5*5*1, C = 10)
    b_ref: (1, C)         conv1 bias
    o_ref: (TB, P, C)     pooled + ReLU'd activations
    """
    TB, Q, P, K = p_ref.shape
    C = w_ref.shape[1]
    # Single stacked matmul: collapse (TB, 4, P) into the MXU M dimension.
    flat = p_ref[...].reshape(TB * Q * P, K)
    m = jnp.dot(flat, w_ref[...], preferred_element_type=jnp.float32)
    m = m.reshape(TB, Q, P, C)
    # Max over the 4 pool positions (VPU, static slices of the outer dim).
    mx = jnp.maximum(jnp.maximum(m[:, 0], m[:, 1]), jnp.maximum(m[:, 2], m[:, 3]))
    # Shared bias commutes with the max; ReLU.
    o_ref[...] = jnp.maximum(mx + b_ref[...], 0.0)


def _conv2_pool_relu_fc_kernel(p_ref, w2_ref, b2_ref, fcw_ref, fcb_ref, o_ref):
    """conv2 (stacked matmul) + 2x2 max-pool + bias + ReLU + fused fc for a batch tile.

    p_ref:   (TB, 4, P, K)   im2col patches from layer-1 activations (P=16, K=250)
    w2_ref:  (K, C2)         conv2 weight matrix (C2 = 20)
    b2_ref:  (1, C2)         conv2 bias
    fcw_ref: (P, C2, N)      fc weight regrouped per pooled position (N = 128, zero-padded)
    fcb_ref: (1, N)          fc bias (zero-padded to N)
    o_ref:   (TB, N)         logits, lane-dense (columns 10..N-1 are zero)
    """
    TB, Q, P, K = p_ref.shape
    C2 = w2_ref.shape[1]
    N = fcw_ref.shape[2]

    flat = p_ref[...].reshape(TB * Q * P, K)
    m = jnp.dot(flat, w2_ref[...], preferred_element_type=jnp.float32)
    m = m.reshape(TB, Q, P, C2)
    mx = jnp.maximum(jnp.maximum(m[:, 0], m[:, 1]), jnp.maximum(m[:, 2], m[:, 3]))
    a2 = jnp.maximum(mx + b2_ref[...], 0.0)          # (TB, P, C2) stays in VMEM/vregs

    # Fused fc: out[b, n] = sum_p sum_c a2[b, p, c] * fcw[p, c, n] + fcb[n].
    # Static 16-iteration loop of small (TB, C2) @ (C2, N) accumulations avoids a
    # sublane->lane flattening relayout of a2; everything stays on-chip.
    acc = jnp.zeros((TB, N), dtype=jnp.float32)
    for p in range(P):
        acc = acc + jnp.dot(a2[:, p, :], fcw_ref[p],
                            preferred_element_type=jnp.float32)
    o_ref[...] = acc + fcb_ref[...]


# --------------------------- pallas_call wrappers --------------------------- #

def _batch_tile(B):
    # Whole batch in one grid step when small; multiple-of-8 tiles otherwise so the
    # 2-D output block stays (8,128)-friendly.
    return B if B <= 8 else 8


def conv1_pool_relu(p1, w1m, b1r):
    B, Q, P, K = p1.shape
    C = w1m.shape[1]
    TB = _batch_tile(B)
    grid = (pl.cdiv(B, TB),)
    flops = 2 * B * Q * P * K * C
    bytes_accessed = 4 * (p1.size + w1m.size + b1r.size + B * P * C)
    return pl.pallas_call(
        _conv1_pool_relu_kernel,
        out_shape=jax.ShapeDtypeStruct((B, P, C), jnp.float32),
        grid=grid,
        in_specs=[
            pl.BlockSpec((TB, Q, P, K), lambda i: (i, 0, 0, 0)),
            pl.BlockSpec((K, C), lambda i: (0, 0)),
            pl.BlockSpec((1, C), lambda i: (0, 0)),
        ],
        out_specs=pl.BlockSpec((TB, P, C), lambda i: (i, 0, 0)),
        compiler_params=pltpu.CompilerParams(dimension_semantics=("parallel",)),
        cost_estimate=pl.CostEstimate(flops=flops, transcendentals=0,
                                      bytes_accessed=bytes_accessed),
    )(p1, w1m, b1r)


def conv2_pool_relu_fc(p2, w2m, b2r, fcw_pos, fcb_row):
    B, Q, P, K = p2.shape
    C2 = w2m.shape[1]
    N = fcw_pos.shape[2]
    TB = _batch_tile(B)
    grid = (pl.cdiv(B, TB),)
    flops = 2 * B * Q * P * K * C2 + 2 * B * P * C2 * N
    bytes_accessed = 4 * (p2.size + w2m.size + b2r.size + fcw_pos.size
                          + fcb_row.size + B * N)
    return pl.pallas_call(
        _conv2_pool_relu_fc_kernel,
        out_shape=jax.ShapeDtypeStruct((B, N), jnp.float32),
        grid=grid,
        in_specs=[
            pl.BlockSpec((TB, Q, P, K), lambda i: (i, 0, 0, 0)),
            pl.BlockSpec((K, C2), lambda i: (0, 0)),
            pl.BlockSpec((1, C2), lambda i: (0, 0)),
            pl.BlockSpec((P, C2, N), lambda i: (0, 0, 0)),
            pl.BlockSpec((1, N), lambda i: (0, 0)),
        ],
        out_specs=pl.BlockSpec((TB, N), lambda i: (i, 0)),
        compiler_params=pltpu.CompilerParams(dimension_semantics=("parallel",)),
        cost_estimate=pl.CostEstimate(flops=flops, transcendentals=0,
                                      bytes_accessed=bytes_accessed),
    )(p2, w2m, b2r, fcw_pos, fcb_row)


# ------------------------------ JAX glue ----------------------------------- #

def _im2col_pool_groups(x_nhwc, k):
    """(B, H, W, C) -> (B, 4, (oh//2)*(ow//2), k*k*C), grouped by 2x2 pool position."""
    B, H, W, C = x_nhwc.shape
    oh, ow = H - k + 1, W - k + 1
    cols = []
    for ki in range(k):
        for kj in range(k):
            cols.append(x_nhwc[:, ki:ki + oh, kj:kj + ow, :])
    p = jnp.stack(cols, axis=3)                       # (B, oh, ow, k*k, C)
    p = p.reshape(B, oh, ow, k * k * C)               # (ki, kj, ci) flatten order
    ph, pw = oh // 2, ow // 2
    p = p.reshape(B, ph, 2, pw, 2, k * k * C)
    p = jnp.transpose(p, (0, 2, 4, 1, 3, 5))          # (B, dy, dx, ph, pw, K)
    return p.reshape(B, 4, ph * pw, k * k * C)


def init_params(key):
    k1, k2, k3, k4, k5, k6 = jax.random.split(key, 6)
    return dict(
        w1=0.1 * jax.random.normal(k1, (10, 1, 5, 5), jnp.float32),    # OIHW
        b1=0.1 * jax.random.normal(k2, (10,), jnp.float32),
        w2=0.1 * jax.random.normal(k3, (20, 10, 5, 5), jnp.float32),   # OIHW
        b2=0.1 * jax.random.normal(k4, (20,), jnp.float32),
        fcw=0.1 * jax.random.normal(k5, (10, 320), jnp.float32),       # (out, C*H*W)
        fcb=0.1 * jax.random.normal(k6, (10,), jnp.float32),
    )


@jax.jit
def net_forward(params, x_nchw):
    B = x_nchw.shape[0]
    x = jnp.transpose(x_nchw, (0, 2, 3, 1))           # NCHW -> NHWC

    # conv weights OIHW -> (KH*KW*Cin, Cout), matching the (ki, kj, ci) patch order
    w1m = jnp.transpose(params["w1"], (2, 3, 1, 0)).reshape(25 * 1, 10)
    b1r = params["b1"].reshape(1, 10)
    w2m = jnp.transpose(params["w2"], (2, 3, 1, 0)).reshape(25 * 10, 20)
    b2r = params["b2"].reshape(1, 20)

    # fc weight regrouped per pooled spatial position p = h*4 + w (PyTorch flattens
    # (C, H, W), i.e. feature index = c*16 + p); pad the output dim 10 -> 128 so the
    # fused-fc result is a lane-dense store.
    NPAD = 128
    fcw_pos = jnp.transpose(params["fcw"].reshape(10, 20, 16), (2, 1, 0))   # (P, C2, 10)
    fcw_pos = jnp.pad(fcw_pos, ((0, 0), (0, 0), (0, NPAD - 10)))            # (16, 20, 128)
    fcb_row = jnp.pad(params["fcb"], (0, NPAD - 10)).reshape(1, NPAD)

    p1 = _im2col_pool_groups(x, 5)                    # (B, 4, 144, 25)
    a1 = conv1_pool_relu(p1, w1m, b1r)                # (B, 144, 10)

    p2 = _im2col_pool_groups(a1.reshape(B, 12, 12, 10), 5)   # (B, 4, 16, 250)
    out_pad = conv2_pool_relu_fc(p2, w2m, b2r, fcw_pos, fcb_row)  # (B, 128)
    return out_pad[:, :10]                            # (B, 10) logits


def net_reference(params, x_nchw):
    """Pure-JAX reference mirroring the PyTorch forward exactly."""
    dn = ("NCHW", "OIHW", "NCHW")
    hp = jax.lax.Precision.HIGHEST
    y = jax.lax.conv_general_dilated(x_nchw, params["w1"], (1, 1), "VALID",
                                     dimension_numbers=dn, precision=hp)
    y = y + params["b1"][None, :, None, None]
    y = jax.lax.reduce_window(y, -jnp.inf, jax.lax.max,
                              (1, 1, 2, 2), (1, 1, 2, 2), "VALID")
    y = jax.nn.relu(y)
    y = jax.lax.conv_general_dilated(y, params["w2"], (1, 1), "VALID",
                                     dimension_numbers=dn, precision=hp)
    y = y + params["b2"][None, :, None, None]
    y = jax.lax.reduce_window(y, -jnp.inf, jax.lax.max,
                              (1, 1, 2, 2), (1, 1, 2, 2), "VALID")
    y = jax.nn.relu(y)
    y = y.reshape(y.shape[0], -1)
    return jnp.dot(y, params["fcw"].T, precision=hp) + params["fcb"]


if __name__ == "__main__":
    key = jax.random.PRNGKey(0)
    pkey, xkey = jax.random.split(key)
    params = init_params(pkey)
    # 28x28 input is required so that the flattened feature is 320 (= 20*4*4)
    x = jax.random.normal(xkey, (2, 1, 28, 28), jnp.float32)   # NCHW like PyTorch

    out = jax.block_until_ready(net_forward(params, x))
    ref = jax.block_until_ready(net_reference(params, x))
    assert out.shape == (2, 10)
    np.testing.assert_allclose(np.asarray(out), np.asarray(ref), rtol=1e-2, atol=1e-2)
    print("KERNEL_OK")
</pallas_src>

<mosaic_0001>
module attributes {stable_mosaic.version = 11 : i64} {
  func.func @_conv1_pool_relu_kernel(%arg0: i32, %arg1: memref<2x4x144x25xf32, #tpu.memory_space<vmem>>, %arg2: memref<25x10xf32, #tpu.memory_space<vmem>>, %arg3: memref<1x10xf32, #tpu.memory_space<vmem>>, %arg4: memref<2x144x10xf32, #tpu.memory_space<vmem>>) attributes {dimension_semantics = [#tpu.dimension_semantics<parallel>], iteration_bounds = array<i64: 1>, scalar_prefetch = 0 : i64, scratch_operands = 0 : i64, tpu.core_type = #tpu.core_type<tc>, window_params = [{transform_indices = @transform_0, window_bounds = array<i64: 2, 4, 144, 25>}, {pipeline_mode = #tpu.pipeline_mode<synchronous>, transform_indices = @transform_1, window_bounds = array<i64: 25, 10>}, {pipeline_mode = #tpu.pipeline_mode<synchronous>, transform_indices = @transform_2, window_bounds = array<i64: 1, 10>}, {transform_indices = @transform_3, window_bounds = array<i64: 2, 144, 10>}]} {
    %c0 = arith.constant 0 : index
    %c0_0 = arith.constant 0 : index
    %c0_1 = arith.constant 0 : index
    %c0_2 = arith.constant 0 : index
    %0 = vector.load %arg1[%c0, %c0_0, %c0_1, %c0_2] : memref<2x4x144x25xf32, #tpu.memory_space<vmem>>, vector<2x4x144x25xf32>
    %1 = vector.shape_cast %0 : vector<2x4x144x25xf32> to vector<1152x25xf32>
    %c0_3 = arith.constant 0 : index
    %c0_4 = arith.constant 0 : index
    %2 = vector.load %arg2[%c0_3, %c0_4] : memref<25x10xf32, #tpu.memory_space<vmem>>, vector<25x10xf32>
    %cst = arith.constant dense<0.000000e+00> : vector<1152x10xf32>
    %3 = tpu.matmul %1, %2, %cst {dimension_numbers = #tpu.dot_dimension_numbers<[1], [0], [0], [1], [0, 0, 1, 1], [], []>} : vector<1152x25xf32>, vector<25x10xf32>, vector<1152x10xf32> -> vector<1152x10xf32>
    %4 = vector.shape_cast %3 : vector<1152x10xf32> to vector<2x4x144x10xf32>
    %5 = vector.extract_strided_slice %4 {offsets = [0, 0, 0, 0], sizes = [2, 1, 144, 10], strides = [1, 1, 1, 1]} : vector<2x4x144x10xf32> to vector<2x1x144x10xf32>
    %6 = vector.shape_cast %5 : vector<2x1x144x10xf32> to vector<2x144x10xf32>
    %7 = vector.extract_strided_slice %4 {offsets = [0, 1, 0, 0], sizes = [2, 1, 144, 10], strides = [1, 1, 1, 1]} : vector<2x4x144x10xf32> to vector<2x1x144x10xf32>
    %8 = vector.shape_cast %7 : vector<2x1x144x10xf32> to vector<2x144x10xf32>
    %9 = arith.maximumf %6, %8 : vector<2x144x10xf32>
    %10 = vector.extract_strided_slice %4 {offsets = [0, 2, 0, 0], sizes = [2, 1, 144, 10], strides = [1, 1, 1, 1]} : vector<2x4x144x10xf32> to vector<2x1x144x10xf32>
    %11 = vector.shape_cast %10 : vector<2x1x144x10xf32> to vector<2x144x10xf32>
    %12 = vector.extract_strided_slice %4 {offsets = [0, 3, 0, 0], sizes = [2, 1, 144, 10], strides = [1, 1, 1, 1]} : vector<2x4x144x10xf32> to vector<2x1x144x10xf32>
    %13 = vector.shape_cast %12 : vector<2x1x144x10xf32> to vector<2x144x10xf32>
    %14 = arith.maximumf %11, %13 : vector<2x144x10xf32>
    %15 = arith.maximumf %9, %14 : vector<2x144x10xf32>
    %c0_5 = arith.constant 0 : index
    %c0_6 = arith.constant 0 : index
    %16 = vector.load %arg3[%c0_5, %c0_6] : memref<1x10xf32, #tpu.memory_space<vmem>>, vector<1x10xf32>
    %17 = vector.shape_cast %16 : vector<1x10xf32> to vector<1x1x10xf32>
    %18 = vector.broadcast %17 : vector<1x1x10xf32> to vector<2x144x10xf32>
    %19 = arith.addf %15, %18 : vector<2x144x10xf32>
    %cst_7 = arith.constant 0.000000e+00 : f32
    %20 = vector.broadcast %cst_7 : f32 to vector<2x144x10xf32>
    %21 = arith.maximumf %19, %20 : vector<2x144x10xf32>
    %c0_8 = arith.constant 0 : index
    %c0_9 = arith.constant 0 : index
    %c0_10 = arith.constant 0 : index
    %22 = vector.load %arg4[%c0_8, %c0_9, %c0_10] : memref<2x144x10xf32, #tpu.memory_space<vmem>>, vector<2x144x10xf32>
    tpu.vector_store %arg4[%c0_8, %c0_9, %c0_10], %21 {strides = array<i32>} : memref<2x144x10xf32, #tpu.memory_space<vmem>>, vector<2x144x10xf32>,
    return
  }
  func.func @transform_0(%arg0: i32) -> (i32, i32, i32, i32) {
    %c0_i32 = arith.constant 0 : i32
    %c0_i32_0 = arith.constant 0 : i32
    %c0_i32_1 = arith.constant 0 : i32
    %c0_i32_2 = arith.constant 0 : i32
    return %arg0, %c0_i32, %c0_i32_0, %c0_i32_1 : i32, i32, i32, i32
  }
  func.func @transform_1(%arg0: i32) -> (i32, i32) {
    %c0_i32 = arith.constant 0 : i32
    %c0_i32_0 = arith.constant 0 : i32
    %c0_i32_1 = arith.constant 0 : i32
    return %c0_i32, %c0_i32_0 : i32, i32
  }
  func.func @transform_2(%arg0: i32) -> (i32, i32) {
    %c0_i32 = arith.constant 0 : i32
    %c0_i32_0 = arith.constant 0 : i32
    %c0_i32_1 = arith.constant 0 : i32
    return %c0_i32, %c0_i32_0 : i32, i32
  }
  func.func @transform_3(%arg0: i32) -> (i32, i32, i32) {
    %c0_i32 = arith.constant 0 : i32
    %c0_i32_0 = arith.constant 0 : i32
    %c0_i32_1 = arith.constant 0 : i32
    return %arg0, %c0_i32, %c0_i32_0 : i32, i32, i32
  }
}

module attributes {stable_mosaic.version = 11 : i64} {
  func.func @_conv2_pool_relu_fc_kernel(%arg0: i32, %arg1: memref<2x4x16x250xf32, #tpu.memory_space<vmem>>, %arg2: memref<250x20xf32, #tpu.memory_space<vmem>>, %arg3: memref<1x20xf32, #tpu.memory_space<vmem>>, %arg4: memref<16x20x128xf32, #tpu.memory_space<vmem>>, %arg5: memref<1x128xf32, #tpu.memory_space<vmem>>, %arg6: memref<2x128xf32, #tpu.memory_space<vmem>>) attributes {dimension_semantics = [#tpu.dimension_semantics<parallel>], iteration_bounds = array<i64: 1>, scalar_prefetch = 0 : i64, scratch_operands = 0 : i64, tpu.core_type = #tpu.core_type<tc>, window_params = [{transform_indices = @transform_0, window_bounds = array<i64: 2, 4, 16, 250>}, {pipeline_mode = #tpu.pipeline_mode<synchronous>, transform_indices = @transform_1, window_bounds = array<i64: 250, 20>}, {pipeline_mode = #tpu.pipeline_mode<synchronous>, transform_indices = @transform_2, window_bounds = array<i64: 1, 20>}, {pipeline_mode = #tpu.pipeline_mode<synchronous>, transform_indices = @transform_3, window_bounds = array<i64: 16, 20, 128>}, {pipeline_mode = #tpu.pipeline_mode<synchronous>, transform_indices = @transform_4, window_bounds = array<i64: 1, 128>}, {transform_indices = @transform_5, window_bounds = array<i64: 2, 128>}]} {
    %c0 = arith.constant 0 : index
    %c0_0 = arith.constant 0 : index
    %c0_1 = arith.constant 0 : index
    %c0_2 = arith.constant 0 : index
    %0 = vector.load %arg1[%c0, %c0_0, %c0_1, %c0_2] : memref<2x4x16x250xf32, #tpu.memory_space<vmem>>, vector<2x4x16x250xf32>
    %1 = vector.shape_cast %0 : vector<2x4x16x250xf32> to vector<128x250xf32>
    %c0_3 = arith.constant 0 : index
    %c0_4 = arith.constant 0 : index
    %2 = vector.load %arg2[%c0_3, %c0_4] : memref<250x20xf32, #tpu.memory_space<vmem>>, vector<250x20xf32>
    %cst = arith.constant dense<0.000000e+00> : vector<128x20xf32>
    %3 = tpu.matmul %1, %2, %cst {dimension_numbers = #tpu.dot_dimension_numbers<[1], [0], [0], [1], [0, 0, 1, 1], [], []>} : vector<128x250xf32>, vector<250x20xf32>, vector<128x20xf32> -> vector<128x20xf32>
    %4 = vector.shape_cast %3 : vector<128x20xf32> to vector<2x4x16x20xf32>
    %5 = vector.extract_strided_slice %4 {offsets = [0, 0, 0, 0], sizes = [2, 1, 16, 20], strides = [1, 1, 1, 1]} : vector<2x4x16x20xf32> to vector<2x1x16x20xf32>
    %6 = vector.shape_cast %5 : vector<2x1x16x20xf32> to vector<2x16x20xf32>
    %7 = vector.extract_strided_slice %4 {offsets = [0, 1, 0, 0], sizes = [2, 1, 16, 20], strides = [1, 1, 1, 1]} : vector<2x4x16x20xf32> to vector<2x1x16x20xf32>
    %8 = vector.shape_cast %7 : vector<2x1x16x20xf32> to vector<2x16x20xf32>
    %9 = arith.maximumf %6, %8 : vector<2x16x20xf32>
    %10 = vector.extract_strided_slice %4 {offsets = [0, 2, 0, 0], sizes = [2, 1, 16, 20], strides = [1, 1, 1, 1]} : vector<2x4x16x20xf32> to vector<2x1x16x20xf32>
    %11 = vector.shape_cast %10 : vector<2x1x16x20xf32> to vector<2x16x20xf32>
    %12 = vector.extract_strided_slice %4 {offsets = [0, 3, 0, 0], sizes = [2, 1, 16, 20], strides = [1, 1, 1, 1]} : vector<2x4x16x20xf32> to vector<2x1x16x20xf32>
    %13 = vector.shape_cast %12 : vector<2x1x16x20xf32> to vector<2x16x20xf32>
    %14 = arith.maximumf %11, %13 : vector<2x16x20xf32>
    %15 = arith.maximumf %9, %14 : vector<2x16x20xf32>
    %c0_5 = arith.constant 0 : index
    %c0_6 = arith.constant 0 : index
    %16 = vector.load %arg3[%c0_5, %c0_6] : memref<1x20xf32, #tpu.memory_space<vmem>>, vector<1x20xf32>
    %17 = vector.shape_cast %16 : vector<1x20xf32> to vector<1x1x20xf32>
    %18 = vector.broadcast %17 : vector<1x1x20xf32> to vector<2x16x20xf32>
    %19 = arith.addf %15, %18 : vector<2x16x20xf32>
    %cst_7 = arith.constant 0.000000e+00 : f32
    %20 = vector.broadcast %cst_7 : f32 to vector<2x16x20xf32>
    %21 = arith.maximumf %19, %20 : vector<2x16x20xf32>
    %cst_8 = arith.constant 0.000000e+00 : f32
    %22 = vector.broadcast %cst_8 : f32 to vector<2x128xf32>
    %23 = vector.extract_strided_slice %21 {offsets = [0, 0, 0], sizes = [2, 1, 20], strides = [1, 1, 1]} : vector<2x16x20xf32> to vector<2x1x20xf32>
    %24 = vector.shape_cast %23 : vector<2x1x20xf32> to vector<2x20xf32>
    %c0_9 = arith.constant 0 : index
    %c0_10 = arith.constant 0 : index
    %c0_11 = arith.constant 0 : index
    %25 = vector.load %arg4[%c0_9, %c0_10, %c0_11] : memref<16x20x128xf32, #tpu.memory_space<vmem>>, vector<1x20x128xf32>
    %26 = vector.shape_cast %25 : vector<1x20x128xf32> to vector<20x128xf32>
    %cst_12 = arith.constant dense<0.000000e+00> : vector<2x128xf32>
    %27 = tpu.matmul %24, %26, %cst_12 {dimension_numbers = #tpu.dot_dimension_numbers<[1], [0], [0], [1], [0, 0, 1, 1], [], []>} : vector<2x20xf32>, vector<20x128xf32>, vector<2x128xf32> -> vector<2x128xf32>
    %28 = arith.addf %22, %27 : vector<2x128xf32>
    %29 = vector.extract_strided_slice %21 {offsets = [0, 1, 0], sizes = [2, 1, 20], strides = [1, 1, 1]} : vector<2x16x20xf32> to vector<2x1x20xf32>
    %30 = vector.shape_cast %29 : vector<2x1x20xf32> to vector<2x20xf32>
    %c1 = arith.constant 1 : index
    %c0_13 = arith.constant 0 : index
    %c0_14 = arith.constant 0 : index
    %31 = vector.load %arg4[%c1, %c0_13, %c0_14] : memref<16x20x128xf32, #tpu.memory_space<vmem>>, vector<1x20x128xf32>
    %32 = vector.shape_cast %31 : vector<1x20x128xf32> to vector<20x128xf32>
    %cst_15 = arith.constant dense<0.000000e+00> : vector<2x128xf32>
    %33 = tpu.matmul %30, %32, %cst_15 {dimension_numbers = #tpu.dot_dimension_numbers<[1], [0], [0], [1], [0, 0, 1, 1], [], []>} : vector<2x20xf32>, vector<20x128xf32>, vector<2x128xf32> -> vector<2x128xf32>
    %34 = arith.addf %28, %33 : vector<2x128xf32>
    %35 = vector.extract_strided_slice %21 {offsets = [0, 2, 0], sizes = [2, 1, 20], strides = [1, 1, 1]} : vector<2x16x20xf32> to vector<2x1x20xf32>
    %36 = vector.shape_cast %35 : vector<2x1x20xf32> to vector<2x20xf32>
    %c2 = arith.constant 2 : index
    %c0_16 = arith.constant 0 : index
    %c0_17 = arith.constant 0 : index
    %37 = vector.load %arg4[%c2, %c0_16, %c0_17] : memref<16x20x128xf32, #tpu.memory_space<vmem>>, vector<1x20x128xf32>
    %38 = vector.shape_cast %37 : vector<1x20x128xf32> to vector<20x128xf32>
    %cst_18 = arith.constant dense<0.000000e+00> : vector<2x128xf32>
    %39 = tpu.matmul %36, %38, %cst_18 {dimension_numbers = #tpu.dot_dimension_numbers<[1], [0], [0], [1], [0, 0, 1, 1], [], []>} : vector<2x20xf32>, vector<20x128xf32>, vector<2x128xf32> -> vector<2x128xf32>
    %40 = arith.addf %34, %39 : vector<2x128xf32>
    %41 = vector.extract_strided_slice %21 {offsets = [0, 3, 0], sizes = [2, 1, 20], strides = [1, 1, 1]} : vector<2x16x20xf32> to vector<2x1x20xf32>
    %42 = vector.shape_cast %41 : vector<2x1x20xf32> to vector<2x20xf32>
    %c3 = arith.constant 3 : index
    %c0_19 = arith.constant 0 : index
    %c0_20 = arith.constant 0 : index
    %43 = vector.load %arg4[%c3, %c0_19, %c0_20] : memref<16x20x128xf32, #tpu.memory_space<vmem>>, vector<1x20x128xf32>
    %44 = vector.shape_cast %43 : vector<1x20x128xf32> to vector<20x128xf32>
    %cst_21 = arith.constant dense<0.000000e+00> : vector<2x128xf32>
    %45 = tpu.matmul %42, %44, %cst_21 {dimension_numbers = #tpu.dot_dimension_numbers<[1], [0], [0], [1], [0, 0, 1, 1], [], []>} : vector<2x20xf32>, vector<20x128xf32>, vector<2x128xf32> -> vector<2x128xf32>
    %46 = arith.addf %40, %45 : vector<2x128xf32>
    %47 = vector.extract_strided_slice %21 {offsets = [0, 4, 0], sizes = [2, 1, 20], strides = [1, 1, 1]} : vector<2x16x20xf32> to vector<2x1x20xf32>
    %48 = vector.shape_cast %47 : vector<2x1x20xf32> to vector<2x20xf32>
    %c4 = arith.constant 4 : index
    %c0_22 = arith.constant 0 : index
    %c0_23 = arith.constant 0 : index
    %49 = vector.load %arg4[%c4, %c0_22, %c0_23] : memref<16x20x128xf32, #tpu.memory_space<vmem>>, vector<1x20x128xf32>
    %50 = vector.shape_cast %49 : vector<1x20x128xf32> to vector<20x128xf32>
    %cst_24 = arith.constant dense<0.000000e+00> : vector<2x128xf32>
    %51 = tpu.matmul %48, %50, %cst_24 {dimension_numbers = #tpu.dot_dimension_numbers<[1], [0], [0], [1], [0, 0, 1, 1], [], []>} : vector<2x20xf32>, vector<20x128xf32>, vector<2x128xf32> -> vector<2x128xf32>
    %52 = arith.addf %46, %51 : vector<2x128xf32>
    %53 = vector.extract_strided_slice %21 {offsets = [0, 5, 0], sizes = [2, 1, 20], strides = [1, 1, 1]} : vector<2x16x20xf32> to vector<2x1x20xf32>
    %54 = vector.shape_cast %53 : vector<2x1x20xf32> to vector<2x20xf32>
    %c5 = arith.constant 5 : index
    %c0_25 = arith.constant 0 : index
    %c0_26 = arith.constant 0 : index
    %55 = vector.load %arg4[%c5, %c0_25, %c0_26] : memref<16x20x128xf32, #tpu.memory_space<vmem>>, vector<1x20x128xf32>
    %56 = vector.shape_cast %55 : vector<1x20x128xf32> to vector<20x128xf32>
    %cst_27 = arith.constant dense<0.000000e+00> : vector<2x128xf32>
    %57 = tpu.matmul %54, %56, %cst_27 {dimension_numbers = #tpu.dot_dimension_numbers<[1], [0], [0], [1], [0, 0, 1, 1], [], []>} : vector<2x20xf32>, vector<20x128xf32>, vector<2x128xf32> -> vector<2x128xf32>
    %58 = arith.addf %52, %57 : vector<2x128xf32>
    %59 = vector.extract_strided_slice %21 {offsets = [0, 6, 0], sizes = [2, 1, 20], strides = [1, 1, 1]} : vector<2x16x20xf32> to vector<2x1x20xf32>
    %60 = vector.shape_cast %59 : vector<2x1x20xf32> to vector<2x20xf32>
    %c6 = arith.constant 6 : index
    %c0_28 = arith.constant 0 : index
    %c0_29 = arith.constant 0 : index
    %61 = vector.load %arg4[%c6, %c0_28, %c0_29] : memref<16x20x128xf32, #tpu.memory_space<vmem>>, vector<1x20x128xf32>
    %62 = vector.shape_cast %61 : vector<1x20x128xf32> to vector<20x128xf32>
    %cst_30 = arith.constant dense<0.000000e+00> : vector<2x128xf32>
    %63 = tpu.matmul %60, %62, %cst_30 {dimension_numbers = #tpu.dot_dimension_numbers<[1], [0], [0], [1], [0, 0, 1, 1], [], []>} : vector<2x20xf32>, vector<20x128xf32>, vector<2x128xf32> -> vector<2x128xf32>
    %64 = arith.addf %58, %63 : vector<2x128xf32>
    %65 = vector.extract_strided_slice %21 {offsets = [0, 7, 0], sizes = [2, 1, 20], strides = [1, 1, 1]} : vector<2x16x20xf32> to vector<2x1x20xf32>
    %66 = vector.shape_cast %65 : vector<2x1x20xf32> to vector<2x20xf32>
    %c7 = arith.constant 7 : index
    %c0_31 = arith.constant 0 : index
    %c0_32 = arith.constant 0 : index
    %67 = vector.load %arg4[%c7, %c0_31, %c0_32] : memref<16x20x128xf32, #tpu.memory_space<vmem>>, vector<1x20x128xf32>
    %68 = vector.shape_cast %67 : vector<1x20x128xf32> to vector<20x128xf32>
    %cst_33 = arith.constant dense<0.000000e+00> : vector<2x128xf32>
    %69 = tpu.matmul %66, %68, %cst_33 {dimension_numbers = #tpu.dot_dimension_numbers<[1], [0], [0], [1], [0, 0, 1, 1], [], []>} : vector<2x20xf32>, vector<20x128xf32>, vector<2x128xf32> -> vector<2x128xf32>
    %70 = arith.addf %64, %69 : vector<2x128xf32>
    %71 = vector.extract_strided_slice %21 {offsets = [0, 8, 0], sizes = [2, 1, 20], strides = [1, 1, 1]} : vector<2x16x20xf32> to vector<2x1x20xf32>
    %72 = vector.shape_cast %71 : vector<2x1x20xf32> to vector<2x20xf32>
    %c8 = arith.constant 8 : index
    %c0_34 = arith.constant 0 : index
    %c0_35 = arith.constant 0 : index
    %73 = vector.load %arg4[%c8, %c0_34, %c0_35] : memref<16x20x128xf32, #tpu.memory_space<vmem>>, vector<1x20x128xf32>
    %74 = vector.shape_cast %73 : vector<1x20x128xf32> to vector<20x128xf32>
    %cst_36 = arith.constant dense<0.000000e+00> : vector<2x128xf32>
    %75 = tpu.matmul %72, %74, %cst_36 {dimension_numbers = #tpu.dot_dimension_numbers<[1], [0], [0], [1], [0, 0, 1, 1], [], []>} : vector<2x20xf32>, vector<20x128xf32>, vector<2x128xf32> -> vector<2x128xf32>
    %76 = arith.addf %70, %75 : vector<2x128xf32>
    %77 = vector.extract_strided_slice %21 {offsets = [0, 9, 0], sizes = [2, 1, 20], strides = [1, 1, 1]} : vector<2x16x20xf32> to vector<2x1x20xf32>
    %78 = vector.shape_cast %77 : vector<2x1x20xf32> to vector<2x20xf32>
    %c9 = arith.constant 9 : index
    %c0_37 = arith.constant 0 : index
    %c0_38 = arith.constant 0 : index
    %79 = vector.load %arg4[%c9, %c0_37, %c0_38] : memref<16x20x128xf32, #tpu.memory_space<vmem>>, vector<1x20x128xf32>
    %80 = vector.shape_cast %79 : vector<1x20x128xf32> to vector<20x128xf32>
    %cst_39 = arith.constant dense<0.000000e+00> : vector<2x128xf32>
    %81 = tpu.matmul %78, %80, %cst_39 {dimension_numbers = #tpu.dot_dimension_numbers<[1], [0], [0], [1], [0, 0, 1, 1], [], []>} : vector<2x20xf32>, vector<20x128xf32>, vector<2x128xf32> -> vector<2x128xf32>
    %82 = arith.addf %76, %81 : vector<2x128xf32>
    %83 = vector.extract_strided_slice %21 {offsets = [0, 10, 0], sizes = [2, 1, 20], strides = [1, 1, 1]} : vector<2x16x20xf32> to vector<2x1x20xf32>
    %84 = vector.shape_cast %83 : vector<2x1x20xf32> to vector<2x20xf32>
    %c10 = arith.constant 10 : index
    %c0_40 = arith.constant 0 : index
    %c0_41 = arith.constant 0 : index
    %85 = vector.load %arg4[%c10, %c0_40, %c0_41] : memref<16x20x128xf32, #tpu.memory_space<vmem>>, vector<1x20x128xf32>
    %86 = vector.shape_cast %85 : vector<1x20x128xf32> to vector<20x128xf32>
    %cst_42 = arith.constant dense<0.000000e+00> : vector<2x128xf32>
    %87 = tpu.matmul %84, %86, %cst_42 {dimension_numbers = #tpu.dot_dimension_numbers<[1], [0], [0], [1], [0, 0, 1, 1], [], []>} : vector<2x20xf32>, vector<20x128xf32>, vector<2x128xf32> -> vector<2x128xf32>
    %88 = arith.addf %82, %87 : vector<2x128xf32>
    %89 = vector.extract_strided_slice %21 {offsets = [0, 11, 0], sizes = [2, 1, 20], strides = [1, 1, 1]} : vector<2x16x20xf32> to vector<2x1x20xf32>
    %90 = vector.shape_cast %89 : vector<2x1x20xf32> to vector<2x20xf32>
    %c11 = arith.constant 11 : index
    %c0_43 = arith.constant 0 : index
    %c0_44 = arith.constant 0 : index
    %91 = vector.load %arg4[%c11, %c0_43, %c0_44] : memref<16x20x128xf32, #tpu.memory_space<vmem>>, vector<1x20x128xf32>
    %92 = vector.shape_cast %91 : vector<1x20x128xf32> to vector<20x128xf32>
    %cst_45 = arith.constant dense<0.000000e+00> : vector<2x128xf32>
    %93 = tpu.matmul %90, %92, %cst_45 {dimension_numbers = #tpu.dot_dimension_numbers<[1], [0], [0], [1], [0, 0, 1, 1], [], []>} : vector<2x20xf32>, vector<20x128xf32>, vector<2x128xf32> -> vector<2x128xf32>
    %94 = arith.addf %88, %93 : vector<2x128xf32>
    %95 = vector.extract_strided_slice %21 {offsets = [0, 12, 0], sizes = [2, 1, 20], strides = [1, 1, 1]} : vector<2x16x20xf32> to vector<2x1x20xf32>
    %96 = vector.shape_cast %95 : vector<2x1x20xf32> to vector<2x20xf32>
    %c12 = arith.constant 12 : index
    %c0_46 = arith.constant 0 : index
    %c0_47 = arith.constant 0 : index
    %97 = vector.load %arg4[%c12, %c0_46, %c0_47] : memref<16x20x128xf32, #tpu.memory_space<vmem>>, vector<1x20x128xf32>
    %98 = vector.shape_cast %97 : vector<1x20x128xf32> to vector<20x128xf32>
    %cst_48 = arith.constant dense<0.000000e+00> : vector<2x128xf32>
    %99 = tpu.matmul %96, %98, %cst_48 {dimension_numbers = #tpu.dot_dimension_numbers<[1], [0], [0], [1], [0, 0, 1, 1], [], []>} : vector<2x20xf32>, vector<20x128xf32>, vector<2x128xf32> -> vector<2x128xf32>
    %100 = arith.addf %94, %99 : vector<2x128xf32>
    %101 = vector.extract_strided_slice %21 {offsets = [0, 13, 0], sizes = [2, 1, 20], strides = [1, 1, 1]} : vector<2x16x20xf32> to vector<2x1x20xf32>
    %102 = vector.shape_cast %101 : vector<2x1x20xf32> to vector<2x20xf32>
    %c13 = arith.constant 13 : index
    %c0_49 = arith.constant 0 : index
    %c0_50 = arith.constant 0 : index
    %103 = vector.load %arg4[%c13, %c0_49, %c0_50] : memref<16x20x128xf32, #tpu.memory_space<vmem>>, vector<1x20x128xf32>
    %104 = vector.shape_cast %103 : vector<1x20x128xf32> to vector<20x128xf32>
    %cst_51 = arith.constant dense<0.000000e+00> : vector<2x128xf32>
    %105 = tpu.matmul %102, %104, %cst_51 {dimension_numbers = #tpu.dot_dimension_numbers<[1], [0], [0], [1], [0, 0, 1, 1], [], []>} : vector<2x20xf32>, vector<20x128xf32>, vector<2x128xf32> -> vector<2x128xf32>
    %106 = arith.addf %100, %105 : vector<2x128xf32>
    %107 = vector.extract_strided_slice %21 {offsets = [0, 14, 0], sizes = [2, 1, 20], strides = [1, 1, 1]} : vector<2x16x20xf32> to vector<2x1x20xf32>
    %108 = vector.shape_cast %107 : vector<2x1x20xf32> to vector<2x20xf32>
    %c14 = arith.constant 14 : index
    %c0_52 = arith.constant 0 : index
    %c0_53 = arith.constant 0 : index
    %109 = vector.load %arg4[%c14, %c0_52, %c0_53] : memref<16x20x128xf32, #tpu.memory_space<vmem>>, vector<1x20x128xf32>
    %110 = vector.shape_cast %109 : vector<1x20x128xf32> to vector<20x128xf32>
    %cst_54 = arith.constant dense<0.000000e+00> : vector<2x128xf32>
    %111 = tpu.matmul %108, %110, %cst_54 {dimension_numbers = #tpu.dot_dimension_numbers<[1], [0], [0], [1], [0, 0, 1, 1], [], []>} : vector<2x20xf32>, vector<20x128xf32>, vector<2x128xf32> -> vector<2x128xf32>
    %112 = arith.addf %106, %111 : vector<2x128xf32>
    %113 = vector.extract_strided_slice %21 {offsets = [0, 15, 0], sizes = [2, 1, 20], strides = [1, 1, 1]} : vector<2x16x20xf32> to vector<2x1x20xf32>
    %114 = vector.shape_cast %113 : vector<2x1x20xf32> to vector<2x20xf32>
    %c15 = arith.constant 15 : index
    %c0_55 = arith.constant 0 : index
    %c0_56 = arith.constant 0 : index
    %115 = vector.load %arg4[%c15, %c0_55, %c0_56] : memref<16x20x128xf32, #tpu.memory_space<vmem>>, vector<1x20x128xf32>
    %116 = vector.shape_cast %115 : vector<1x20x128xf32> to vector<20x128xf32>
    %cst_57 = arith.constant dense<0.000000e+00> : vector<2x128xf32>
    %117 = tpu.matmul %114, %116, %cst_57 {dimension_numbers = #tpu.dot_dimension_numbers<[1], [0], [0], [1], [0, 0, 1, 1], [], []>} : vector<2x20xf32>, vector<20x128xf32>, vector<2x128xf32> -> vector<2x128xf32>
    %118 = arith.addf %112, %117 : vector<2x128xf32>
    %c0_58 = arith.constant 0 : index
    %c0_59 = arith.constant 0 : index
    %119 = vector.load %arg5[%c0_58, %c0_59] : memref<1x128xf32, #tpu.memory_space<vmem>>, vector<1x128xf32>
    %120 = vector.broadcast %119 : vector<1x128xf32> to vector<2x128xf32>
    %121 = arith.addf %118, %120 : vector<2x128xf32>
    %c0_60 = arith.constant 0 : index
    %c0_61 = arith.constant 0 : index
    %122 = vector.load %arg6[%c0_60, %c0_61] : memref<2x128xf32, #tpu.memory_space<vmem>>, vector<2x128xf32>
    tpu.vector_store %arg6[%c0_60, %c0_61], %121 {strides = array<i32>} : memref<2x128xf32, #tpu.memory_space<vmem>>, vector<2x128xf32>,
    return
  }
  func.func @transform_0(%arg0: i32) -> (i32, i32, i32, i32) {
    %c0_i32 = arith.constant 0 : i32
    %c0_i32_0 = arith.constant 0 : i32
    %c0_i32_1 = arith.constant 0 : i32
    %c0_i32_2 = arith.constant 0 : i32
    return %arg0, %c0_i32, %c0_i32_0, %c0_i32_1 : i32, i32, i32, i32
  }
  func.func @transform_1(%arg0: i32) -> (i32, i32) {
    %c0_i32 = arith.constant 0 : i32
    %c0_i32_0 = arith.constant 0 : i32
    %c0_i32_1 = arith.constant 0 : i32
    return %c0_i32, %c0_i32_0 : i32, i32
  }
  func.func @transform_2(%arg0: i32) -> (i32, i32) {
    %c0_i32 = arith.constant 0 : i32
    %c0_i32_0 = arith.constant 0 : i32
    %c0_i32_1 = arith.constant 0 : i32
    return %c0_i32, %c0_i32_0 : i32, i32
  }
  func.func @transform_3(%arg0: i32) -> (i32, i32, i32) {
    %c0_i32 = arith.constant 0 : i32
    %c0_i32_0 = arith.constant 0 : i32
    %c0_i32_1 = arith.constant 0 : i32
    %c0_i32_2 = arith.constant 0 : i32
    return %c0_i32, %c0_i32_0, %c0_i32_1 : i32, i32, i32
  }
  func.func @transform_4(%arg0: i32) -> (i32, i32) {
    %c0_i32 = arith.constant 0 : i32
    %c0_i32_0 = arith.constant 0 : i32
    %c0_i32_1 = arith.constant 0 : i32
    return %c0_i32, %c0_i32_0 : i32, i32
  }
  func.func @transform_5(%arg0: i32) -> (i32, i32) {
    %c0_i32 = arith.constant 0 : i32
    %c0_i32_0 = arith.constant 0 : i32
    return %arg0, %c0_i32 : i32, i32
  }
}

</mosaic_0001>

<bundles_post_ra>
// kernel: net_forward.2
= control target key start
LH: loop header
LB: loop body
LE: loop exit
PB: predicated region body
PF: predicated region fallthrough
CT: control target
= control target key end

     0   :  { %vm595_vm0 = vcmask 1040384   ;;  %vm162_vm1 = vcmask 203776   ;;  %vm2145_vm2 = vmmov 1   ;;  %vm1571_vm4 = vcmask 80896   ;;  %s3359_s1 = inlined_call_operand.vmem [shape: f32[25,10], index: 1, kind: input, shape index: {}]   ;;  %s3360_s0 = inlined_call_operand.vmem [shape: f32[2,4,144,25], index: 0, kind: input, shape index: {}]   ;;  %s3361_s2 = inlined_call_operand.vmem [shape: f32[1,10], index: 2, kind: input, shape index: {}]   ;;  %s3362_s3 = inlined_call_operand.vmem [shape: f32[2,144,10], index: 3, kind: output, shape index: {}]  }
   0x1   :  { %v158_v0 = vld [vmem:[%s3359_s1] sm:$0xff]  ;;  %v159_v1 = vld [vmem:[%s3359_s1 + $0x8] sm:$0xff]  ;;  %v160_v2 = vld [vmem:[%s3359_s1 + $0x10] sm:$0xff] }
   0x2   :  { %v2130_v3 = vpack.c.bf16 %v159_v1, %v158_v0  ;;  %v161_v4 = vld [vmem:[%s3359_s1 + $0x18] sm:$0x1]  ;;  %v14_v5 = vld [vmem:[%s3360_s0] sm:$0xff]  ;;  %vm2135_vm3 = vmpackc.low %vm595_vm0, %vm2145_vm2 }
   0x3   :  { %v2134_v6 = vpack.c.bf16 %v161_v4, %v160_v2  ;;  %1914 = vmatprep.mubr.msk.f32.mxu0 %vm162_vm1, %v14_v5  ;;  %v86_v7 = vld [vmem:[%s3360_s0 + $0x240] sm:$0xff]  ;;  %v15_v8 = vld [vmem:[%s3360_s0 + $0x8] sm:$0xff]  ;;  %v16_v10 = vld [vmem:[%s3360_s0 + $0x10] sm:$0xff] }
   0x4   :  { %2131 = vmatprep.subr.bf16.mxu0 %v2130_v3  ;;  %2140 = vmatprep.subr.bf16.mxu1 %v2130_v3  ;;  %v87_v9 = vld [vmem:[%s3360_s0 + $0x248] sm:$0xff]  ;;  %v88_v11 = vld [vmem:[%s3360_s0 + $0x250] sm:$0xff]  ;;  %v17_v12 = vld [vmem:[%s3360_s0 + $0x18] sm:$0xff] }
   0x5   :  { %2133 = vmatpush3.bf16.msra.mxu0 %v2130_v3  ;;  %2142 = vmatpush3.bf16.msra.mxu1 %v2130_v3  ;;  %v89_v13 = vld [vmem:[%s3360_s0 + $0x258] sm:$0xff]  ;;  %v18_v14 = vld [vmem:[%s3360_s0 + $0x20] sm:$0xff]  ;;  %v19_v16 = vld [vmem:[%s3360_s0 + $0x28] sm:$0xff] }
   0x6   :  { %2136 = vmatprep.subr.msk.bf16.mxu0 %vm2135_vm3, %v2134_v6  ;;  %2141 = vmatprep.subr.msk.bf16.mxu1 %vm2135_vm3, %v2134_v6  ;;  %v90_v15 = vld [vmem:[%s3360_s0 + $0x260] sm:$0xff]  ;;  %v91_v17 = vld [vmem:[%s3360_s0 + $0x268] sm:$0xff]  ;;  %v20_v18 = vld [vmem:[%s3360_s0 + $0x30] sm:$0xff] }
   0x7   :  { %2022 = vmatprep.mubr.msk.f32.mxu1 %vm162_vm1, %v86_v7  ;;  %v92_v19 = vld [vmem:[%s3360_s0 + $0x270] sm:$0xff]  ;;  %v21_v20 = vld [vmem:[%s3360_s0 + $0x38] sm:$0xff]  ;;  %v22_v22 = vld [vmem:[%s3360_s0 + $0x40] sm:$0xff] }
   0x8   :  { %v93_v21 = vld [vmem:[%s3360_s0 + $0x278] sm:$0xff]  ;;  %v94_v23 = vld [vmem:[%s3360_s0 + $0x280] sm:$0xff]  ;;  %v23_v24 = vld [vmem:[%s3360_s0 + $0x48] sm:$0xff] }
   0x9   :  { %2139 = vmatpush3.bf16.msk.msra.mxu0 %vm2135_vm3, %v2134_v6  ;;  %2143 = vmatpush3.bf16.msk.msra.mxu1 %vm2135_vm3, %v2134_v6  ;;  %v95_v25 = vld [vmem:[%s3360_s0 + $0x288] sm:$0xff]  ;;  %v24_v26 = vld [vmem:[%s3360_s0 + $0x50] sm:$0xff]  ;;  %v25_v28 = vld [vmem:[%s3360_s0 + $0x58] sm:$0xff] }
   0xa   :  { %v96_v27 = vld [vmem:[%s3360_s0 + $0x290] sm:$0xff]  ;;  %v97_v29 = vld [vmem:[%s3360_s0 + $0x298] sm:$0xff]  ;;  %v26_v30 = vld [vmem:[%s3360_s0 + $0x60] sm:$0xff] }
   0xb   :  { %v98_v31 = vld [vmem:[%s3360_s0 + $0x2a0] sm:$0xff]  ;;  %v27_v32 = vld [vmem:[%s3360_s0 + $0x68] sm:$0xff]  ;;  %v28_v34 = vld [vmem:[%s3360_s0 + $0x70] sm:$0xff] }
   0xc   :  { %1915 = vmatmul.mubr.msk.f32.vlgmr.msra.gmra.mrb[0].mxu0 %vm162_vm1, %v15_v8  ;;  %2023 = vmatmul.mubr.msk.f32.vlgmr.msra.gmra.mrb[0].mxu1 %vm162_vm1, %v87_v9  ;;  %v99_v33 = vld [vmem:[%s3360_s0 + $0x2a8] sm:$0xff]  ;;  %v100_v35 = vld [vmem:[%s3360_s0 + $0x2b0] sm:$0xff]  ;;  %v29_v36 = vld [vmem:[%s3360_s0 + $0x78] sm:$0xff] }
   0xd   :  { %1917 = vmatprep.mubr.msk.f32.mxu0 %vm162_vm1, %v16_v10  ;;  %2025 = vmatprep.mubr.msk.f32.mxu1 %vm162_vm1, %v88_v11  ;;  %v101_v37 = vld [vmem:[%s3360_s0 + $0x2b8] sm:$0xff]  ;;  %v30_v38 = vld [vmem:[%s3360_s0 + $0x80] sm:$0xff]  ;;  %v31_v40 = vld [vmem:[%s3360_s0 + $0x88] sm:$0xff] }
   0xe   :  { %v102_v39 = vld [vmem:[%s3360_s0 + $0x2c0] sm:$0xff]  ;;  %v103_v41 = vld [vmem:[%s3360_s0 + $0x2c8] sm:$0xff]  ;;  %v32_v42 = vld [vmem:[%s3360_s0 + $0x90] sm:$0xff] }
   0xf   :  { %v104_v43 = vld [vmem:[%s3360_s0 + $0x2d0] sm:$0xff]  ;;  %v33_v44 = vld [vmem:[%s3360_s0 + $0x98] sm:$0xff]  ;;  %v34_v46 = vld [vmem:[%s3360_s0 + $0xa0] sm:$0xff] }
  0x10   :  { %1918 = vmatmul.mubr.msk.f32.gmra.mrb[2].mxu0 %vm162_vm1, %v17_v12  ;;  %2026 = vmatmul.mubr.msk.f32.gmra.mrb[2].mxu1 %vm162_vm1, %v89_v13  ;;  %v105_v45 = vld [vmem:[%s3360_s0 + $0x2d8] sm:$0xff]  ;;  %v106_v47 = vld [vmem:[%s3360_s0 + $0x2e0] sm:$0xff]  ;;  %v35_v48 = vld [vmem:[%s3360_s0 + $0xa8] sm:$0xff] }
  0x11   :  { %1920 = vmatprep.mubr.msk.f32.mxu0 %vm162_vm1, %v18_v14  ;;  %2028 = vmatprep.mubr.msk.f32.mxu1 %vm162_vm1, %v90_v15  ;;  %v107_v49 = vld [vmem:[%s3360_s0 + $0x2e8] sm:$0xff]  ;;  %v36_v50 = vld [vmem:[%s3360_s0 + $0xb0] sm:$0xff]  ;;  %v37_v52 = vld [vmem:[%s3360_s0 + $0xb8] sm:$0xff] }
  0x12   :  { %v108_v51 = vld [vmem:[%s3360_s0 + $0x2f0] sm:$0xff]  ;;  %v109_v53 = vld [vmem:[%s3360_s0 + $0x2f8] sm:$0xff]  ;;  %v38_v54 = vld [vmem:[%s3360_s0 + $0xc0] sm:$0xff] }
  0x13   :  { %v110_v55 = vld [vmem:[%s3360_s0 + $0x300] sm:$0xff]  ;;  %v39_v56 = vld [vmem:[%s3360_s0 + $0xc8] sm:$0xff]  ;;  %v40_v58 = vld [vmem:[%s3360_s0 + $0xd0] sm:$0xff] }
  0x14   :  { %1921 = vmatmul.mubr.msk.f32.gmra.mrb[4].mxu0 %vm162_vm1, %v19_v16  ;;  %2029 = vmatmul.mubr.msk.f32.gmra.mrb[4].mxu1 %vm162_vm1, %v91_v17  ;;  %v111_v57 = vld [vmem:[%s3360_s0 + $0x308] sm:$0xff]  ;;  %v112_v59 = vld [vmem:[%s3360_s0 + $0x310] sm:$0xff]  ;;  %v41_v60 = vld [vmem:[%s3360_s0 + $0xd8] sm:$0xff] }
  0x15   :  { %1923 = vmatprep.mubr.msk.f32.mxu0 %vm162_vm1, %v20_v18  ;;  %2031 = vmatprep.mubr.msk.f32.mxu1 %vm162_vm1, %v92_v19  ;;  %v113_v61 = vld [vmem:[%s3360_s0 + $0x318] sm:$0xff]  ;;  %v42_v62 = vld [vmem:[%s3360_s0 + $0xe0] sm:$0xff]  ;;  %v43_v0 = vld [vmem:[%s3360_s0 + $0xe8] sm:$0xff] }
  0x16   :  { %v114_v63 = vld [vmem:[%s3360_s0 + $0x320] sm:$0xff]  ;;  %v115_v1 = vld [vmem:[%s3360_s0 + $0x328] sm:$0xff]  ;;  %v44_v2 = vld [vmem:[%s3360_s0 + $0xf0] sm:$0xff] }
  0x17   :  { %v116_v3 = vld [vmem:[%s3360_s0 + $0x330] sm:$0xff]  ;;  %v45_v4 = vld [vmem:[%s3360_s0 + $0xf8] sm:$0xff]  ;;  %v46_v6 = vld [vmem:[%s3360_s0 + $0x100] sm:$0xff] }
  0x18   :  { %1924 = vmatmul.mubr.msk.f32.gmra.mrb[6].mxu0 %vm162_vm1, %v21_v20  ;;  %2032 = vmatmul.mubr.msk.f32.gmra.mrb[6].mxu1 %vm162_vm1, %v93_v21  ;;  %v117_v5 = vld [vmem:[%s3360_s0 + $0x338] sm:$0xff]  ;;  %v118_v7 = vld [vmem:[%s3360_s0 + $0x340] sm:$0xff]  ;;  %v47_v8 = vld [vmem:[%s3360_s0 + $0x108] sm:$0xff] }
  0x19   :  { %1926 = vmatprep.mubr.msk.f32.mxu0 %vm162_vm1, %v22_v22  ;;  %2034 = vmatprep.mubr.msk.f32.mxu1 %vm162_vm1, %v94_v23  ;;  %v119_v9 = vld [vmem:[%s3360_s0 + $0x348] sm:$0xff]  ;;  %v48_v10 = vld [vmem:[%s3360_s0 + $0x110] sm:$0xff]  ;;  %v49_v12 = vld [vmem:[%s3360_s0 + $0x118] sm:$0xff] }
  0x1a   :  { %v120_v11 = vld [vmem:[%s3360_s0 + $0x350] sm:$0xff]  ;;  %v121_v13 = vld [vmem:[%s3360_s0 + $0x358] sm:$0xff]  ;;  %v50_v14 = vld [vmem:[%s3360_s0 + $0x120] sm:$0xff] }
  0x1b   :  { %v122_v15 = vld [vmem:[%s3360_s0 + $0x360] sm:$0xff]  ;;  %v51_v16 = vld [vmem:[%s3360_s0 + $0x128] sm:$0xff]  ;;  %v52_v18 = vld [vmem:[%s3360_s0 + $0x130] sm:$0xff] }
  0x1c   :  { %1927 = vmatmul.mubr.msk.f32.gmra.mrb[8].mxu0 %vm162_vm1, %v23_v24  ;;  %2035 = vmatmul.mubr.msk.f32.gmra.mrb[8].mxu1 %vm162_vm1, %v95_v25  ;;  %v123_v17 = vld [vmem:[%s3360_s0 + $0x368] sm:$0xff]  ;;  %v124_v19 = vld [vmem:[%s3360_s0 + $0x370] sm:$0xff]  ;;  %v53_v20 = vld [vmem:[%s3360_s0 + $0x138] sm:$0xff] }
  0x1d   :  { %1929 = vmatprep.mubr.msk.f32.mxu0 %vm162_vm1, %v24_v26  ;;  %2037 = vmatprep.mubr.msk.f32.mxu1 %vm162_vm1, %v96_v27  ;;  %v125_v21 = vld [vmem:[%s3360_s0 + $0x378] sm:$0xff]  ;;  %v54_v22 = vld [vmem:[%s3360_s0 + $0x140] sm:$0xff]  ;;  %v55_v24 = vld [vmem:[%s3360_s0 + $0x148] sm:$0xff] }
  0x1e   :  { %v126_v23 = vld [vmem:[%s3360_s0 + $0x380] sm:$0xff]  ;;  %v127_v25 = vld [vmem:[%s3360_s0 + $0x388] sm:$0xff]  ;;  %v56_v26 = vld [vmem:[%s3360_s0 + $0x150] sm:$0xff] }
  0x1f   :  { %v128_v27 = vld [vmem:[%s3360_s0 + $0x390] sm:$0xff] }
  0x20   :  { %1930 = vmatmul.mubr.msk.f32.gmra.mrb[10].mxu0 %vm162_vm1, %v25_v28  ;;  %2038 = vmatmul.mubr.msk.f32.gmra.mrb[10].mxu1 %vm162_vm1, %v97_v29  ;;  %v57_v28 = vld [vmem:[%s3360_s0 + $0x158] sm:$0xff] }
  0x21   :  { %1932 = vmatprep.mubr.msk.f32.mxu0 %vm162_vm1, %v26_v30  ;;  %2040 = vmatprep.mubr.msk.f32.mxu1 %vm162_vm1, %v98_v31  ;;  %v129_v29 = vld [vmem:[%s3360_s0 + $0x398] sm:$0xff]  ;;  %v58_v30 = vld [vmem:[%s3360_s0 + $0x160] sm:$0xff] }
  0x22   :  { %v130_v31 = vld [vmem:[%s3360_s0 + $0x3a0] sm:$0xff] }
  0x24   :  { %1933 = vmatmul.mubr.msk.f32.gmra.mrb[12].mxu0 %vm162_vm1, %v27_v32  ;;  %2041 = vmatmul.mubr.msk.f32.gmra.mrb[12].mxu1 %vm162_vm1, %v99_v33  ;;  %v59_v32 = vld [vmem:[%s3360_s0 + $0x168] sm:$0xff] }
  0x25   :  { %1935 = vmatprep.mubr.msk.f32.mxu0 %vm162_vm1, %v28_v34  ;;  %2043 = vmatprep.mubr.msk.f32.mxu1 %vm162_vm1, %v100_v35  ;;  %v131_v33 = vld [vmem:[%s3360_s0 + $0x3a8] sm:$0xff]  ;;  %v60_v34 = vld [vmem:[%s3360_s0 + $0x170] sm:$0xff] }
  0x26   :  { %v132_v35 = vld [vmem:[%s3360_s0 + $0x3b0] sm:$0xff] }
  0x28   :  { %1936 = vmatmul.mubr.msk.f32.gmra.mrb[14].mxu0 %vm162_vm1, %v29_v36  ;;  %2044 = vmatmul.mubr.msk.f32.gmra.mrb[14].mxu1 %vm162_vm1, %v101_v37  ;;  %v61_v36 = vld [vmem:[%s3360_s0 + $0x178] sm:$0xff] }
  0x29   :  { %1938 = vmatprep.mubr.msk.f32.mxu0 %vm162_vm1, %v30_v38  ;;  %2046 = vmatprep.mubr.msk.f32.mxu1 %vm162_vm1, %v102_v39  ;;  %v133_v37 = vld [vmem:[%s3360_s0 + $0x3b8] sm:$0xff]  ;;  %v62_v38 = vld [vmem:[%s3360_s0 + $0x180] sm:$0xff] }
  0x2a   :  { %v134_v39 = vld [vmem:[%s3360_s0 + $0x3c0] sm:$0xff] }
  0x2c   :  { %1939 = vmatmul.mubr.msk.f32.gmra.mrb[16].mxu0 %vm162_vm1, %v31_v40  ;;  %2047 = vmatmul.mubr.msk.f32.gmra.mrb[16].mxu1 %vm162_vm1, %v103_v41  ;;  %v63_v40 = vld [vmem:[%s3360_s0 + $0x188] sm:$0xff] }
  0x2d   :  { %1941 = vmatprep.mubr.msk.f32.mxu0 %vm162_vm1, %v32_v42  ;;  %2049 = vmatprep.mubr.msk.f32.mxu1 %vm162_vm1, %v104_v43  ;;  %v135_v41 = vld [vmem:[%s3360_s0 + $0x3c8] sm:$0xff]  ;;  %v64_v42 = vld [vmem:[%s3360_s0 + $0x190] sm:$0xff] }
  0x2e   :  { %v136_v43 = vld [vmem:[%s3360_s0 + $0x3d0] sm:$0xff] }
  0x30   :  { %1942 = vmatmul.mubr.msk.f32.gmra.mrb[18].mxu0 %vm162_vm1, %v33_v44  ;;  %2050 = vmatmul.mubr.msk.f32.gmra.mrb[18].mxu1 %vm162_vm1, %v105_v45  ;;  %v65_v44 = vld [vmem:[%s3360_s0 + $0x198] sm:$0xff] }
  0x31   :  { %1944 = vmatprep.mubr.msk.f32.mxu0 %vm162_vm1, %v34_v46  ;;  %2052 = vmatprep.mubr.msk.f32.mxu1 %vm162_vm1, %v106_v47  ;;  %v137_v45 = vld [vmem:[%s3360_s0 + $0x3d8] sm:$0xff]  ;;  %v66_v46 = vld [vmem:[%s3360_s0 + $0x1a0] sm:$0xff] }
  0x32   :  { %v138_v47 = vld [vmem:[%s3360_s0 + $0x3e0] sm:$0xff] }
  0x34   :  { %1945 = vmatmul.mubr.msk.f32.gmra.mrb[20].mxu0 %vm162_vm1, %v35_v48  ;;  %2053 = vmatmul.mubr.msk.f32.gmra.mrb[20].mxu1 %vm162_vm1, %v107_v49  ;;  %v67_v48 = vld [vmem:[%s3360_s0 + $0x1a8] sm:$0xff] }
  0x35   :  { %1947 = vmatprep.mubr.msk.f32.mxu0 %vm162_vm1, %v36_v50  ;;  %2055 = vmatprep.mubr.msk.f32.mxu1 %vm162_vm1, %v108_v51  ;;  %v139_v49 = vld [vmem:[%s3360_s0 + $0x3e8] sm:$0xff]  ;;  %v68_v50 = vld [vmem:[%s3360_s0 + $0x1b0] sm:$0xff] }
  0x36   :  { %v140_v51 = vld [vmem:[%s3360_s0 + $0x3f0] sm:$0xff] }
  0x38   :  { %1948 = vmatmul.mubr.msk.f32.gmra.mrb[22].mxu0 %vm162_vm1, %v37_v52  ;;  %2056 = vmatmul.mubr.msk.f32.gmra.mrb[22].mxu1 %vm162_vm1, %v109_v53  ;;  %v69_v52 = vld [vmem:[%s3360_s0 + $0x1b8] sm:$0xff] }
  0x39   :  { %1950 = vmatprep.mubr.msk.f32.mxu0 %vm162_vm1, %v38_v54  ;;  %2058 = vmatprep.mubr.msk.f32.mxu1 %vm162_vm1, %v110_v55  ;;  %v141_v53 = vld [vmem:[%s3360_s0 + $0x3f8] sm:$0xff]  ;;  %v70_v54 = vld [vmem:[%s3360_s0 + $0x1c0] sm:$0xff] }
  0x3a   :  { %v142_v55 = vld [vmem:[%s3360_s0 + $0x400] sm:$0xff] }
  0x3c   :  { %1951 = vmatmul.mubr.msk.f32.gmra.mrb[24].mxu0 %vm162_vm1, %v39_v56  ;;  %2059 = vmatmul.mubr.msk.f32.gmra.mrb[24].mxu1 %vm162_vm1, %v111_v57  ;;  %v71_v56 = vld [vmem:[%s3360_s0 + $0x1c8] sm:$0xff] }
  0x3d   :  { %1953 = vmatprep.mubr.msk.f32.mxu0 %vm162_vm1, %v40_v58  ;;  %2061 = vmatprep.mubr.msk.f32.mxu1 %vm162_vm1, %v112_v59  ;;  %v143_v57 = vld [vmem:[%s3360_s0 + $0x408] sm:$0xff]  ;;  %v72_v58 = vld [vmem:[%s3360_s0 + $0x1d0] sm:$0xff] }
  0x3e   :  { %v144_v59 = vld [vmem:[%s3360_s0 + $0x410] sm:$0xff] }
  0x40   :  { %1954 = vmatmul.mubr.msk.f32.gmra.mrb[26].mxu0 %vm162_vm1, %v41_v60  ;;  %2062 = vmatmul.mubr.msk.f32.gmra.mrb[26].mxu1 %vm162_vm1, %v113_v61  ;;  %v73_v60 = vld [vmem:[%s3360_s0 + $0x1d8] sm:$0xff] }
  0x41   :  { %1956 = vmatprep.mubr.msk.f32.mxu0 %vm162_vm1, %v42_v62  ;;  %2064 = vmatprep.mubr.msk.f32.mxu1 %vm162_vm1, %v114_v63  ;;  %v145_v61 = vld [vmem:[%s3360_s0 + $0x418] sm:$0xff]  ;;  %v74_v62 = vld [vmem:[%s3360_s0 + $0x1e0] sm:$0xff] }
  0x42   :  { %v146_v63 = vld [vmem:[%s3360_s0 + $0x420] sm:$0xff] }
  0x44   :  { %1957 = vmatmul.mubr.msk.f32.gmra.mrb[28].mxu0 %vm162_vm1, %v43_v0  ;;  %2065 = vmatmul.mubr.msk.f32.gmra.mrb[28].mxu1 %vm162_vm1, %v115_v1  ;;  %v75_v0 = vld [vmem:[%s3360_s0 + $0x1e8] sm:$0xff] }
  0x45   :  { %1959 = vmatprep.mubr.msk.f32.mxu0 %vm162_vm1, %v44_v2  ;;  %2067 = vmatprep.mubr.msk.f32.mxu1 %vm162_vm1, %v116_v3  ;;  %v147_v1 = vld [vmem:[%s3360_s0 + $0x428] sm:$0xff]  ;;  %v76_v2 = vld [vmem:[%s3360_s0 + $0x1f0] sm:$0xff] }
  0x46   :  { %v148_v3 = vld [vmem:[%s3360_s0 + $0x430] sm:$0xff] }
  0x48   :  { %1960 = vmatmul.mubr.msk.f32.gmra.mrb[30].mxu0 %vm162_vm1, %v45_v4  ;;  %2068 = vmatmul.mubr.msk.f32.gmra.mrb[30].mxu1 %vm162_vm1, %v117_v5  ;;  %v77_v4 = vld [vmem:[%s3360_s0 + $0x1f8] sm:$0xff] }
  0x49   :  { %1962 = vmatprep.mubr.msk.f32.mxu0 %vm162_vm1, %v46_v6  ;;  %2070 = vmatprep.mubr.msk.f32.mxu1 %vm162_vm1, %v118_v7  ;;  %v149_v5 = vld [vmem:[%s3360_s0 + $0x438] sm:$0xff]  ;;  %v78_v6 = vld [vmem:[%s3360_s0 + $0x200] sm:$0xff] }
  0x4a   :  { %v150_v7 = vld [vmem:[%s3360_s0 + $0x440] sm:$0xff] }
  0x4c   :  { %1963 = vmatmul.mubr.msk.f32.gmra.mrb[32].mxu0 %vm162_vm1, %v47_v8  ;;  %2071 = vmatmul.mubr.msk.f32.gmra.mrb[32].mxu1 %vm162_vm1, %v119_v9  ;;  %v79_v8 = vld [vmem:[%s3360_s0 + $0x208] sm:$0xff] }
  0x4d   :  { %1965 = vmatprep.mubr.msk.f32.mxu0 %vm162_vm1, %v48_v10  ;;  %2073 = vmatprep.mubr.msk.f32.mxu1 %vm162_vm1, %v120_v11  ;;  %v151_v9 = vld [vmem:[%s3360_s0 + $0x448] sm:$0xff]  ;;  %v80_v10 = vld [vmem:[%s3360_s0 + $0x210] sm:$0xff] }
  0x4e   :  { %v152_v11 = vld [vmem:[%s3360_s0 + $0x450] sm:$0xff] }
  0x50   :  { %1966 = vmatmul.mubr.msk.f32.gmra.mrb[34].mxu0 %vm162_vm1, %v49_v12  ;;  %2074 = vmatmul.mubr.msk.f32.gmra.mrb[34].mxu1 %vm162_vm1, %v121_v13  ;;  %v81_v12 = vld [vmem:[%s3360_s0 + $0x218] sm:$0xff] }
  0x51   :  { %1968 = vmatprep.mubr.msk.f32.mxu0 %vm162_vm1, %v50_v14  ;;  %2076 = vmatprep.mubr.msk.f32.mxu1 %vm162_vm1, %v122_v15  ;;  %v153_v13 = vld [vmem:[%s3360_s0 + $0x458] sm:$0xff]  ;;  %v82_v14 = vld [vmem:[%s3360_s0 + $0x220] sm:$0xff] }
  0x52   :  { %v154_v15 = vld [vmem:[%s3360_s0 + $0x460] sm:$0xff] }
  0x54   :  { %1969 = vmatmul.mubr.msk.f32.gmra.mrb[36].mxu0 %vm162_vm1, %v51_v16  ;;  %2077 = vmatmul.mubr.msk.f32.gmra.mrb[36].mxu1 %vm162_vm1, %v123_v17  ;;  %v83_v16 = vld [vmem:[%s3360_s0 + $0x228] sm:$0xff] }
  0x55   :  { %1971 = vmatprep.mubr.msk.f32.mxu0 %vm162_vm1, %v52_v18  ;;  %2079 = vmatprep.mubr.msk.f32.mxu1 %vm162_vm1, %v124_v19  ;;  %v155_v17 = vld [vmem:[%s3360_s0 + $0x468] sm:$0xff]  ;;  %v84_v18 = vld [vmem:[%s3360_s0 + $0x230] sm:$0xff] }
  0x56   :  { %v156_v19 = vld [vmem:[%s3360_s0 + $0x470] sm:$0xff] }
  0x58   :  { %1972 = vmatmul.mubr.msk.f32.gmra.mrb[38].mxu0 %vm162_vm1, %v53_v20  ;;  %2080 = vmatmul.mubr.msk.f32.gmra.mrb[38].mxu1 %vm162_vm1, %v125_v21  ;;  %v85_v20 = vld [vmem:[%s3360_s0 + $0x238] sm:$0xff] }
  0x59   :  { %1974 = vmatprep.mubr.msk.f32.mxu0 %vm162_vm1, %v54_v22  ;;  %2082 = vmatprep.mubr.msk.f32.mxu1 %vm162_vm1, %v126_v23  ;;  %v157_v21 = vld [vmem:[%s3360_s0 + $0x478] sm:$0xff] }
  0x5c   :  { %1975 = vmatmul.mubr.msk.f32.gmra.mrb[40].mxu0 %vm162_vm1, %v55_v24  ;;  %2083 = vmatmul.mubr.msk.f32.gmra.mrb[40].mxu1 %vm162_vm1, %v127_v25 }
  0x5d   :  { %1977 = vmatprep.mubr.msk.f32.mxu0 %vm162_vm1, %v56_v26  ;;  %2085 = vmatprep.mubr.msk.f32.mxu1 %vm162_vm1, %v128_v27 }
  0x60   :  { %1978 = vmatmul.mubr.msk.f32.gmra.mrb[42].mxu0 %vm162_vm1, %v57_v28  ;;  %2086 = vmatmul.mubr.msk.f32.gmra.mrb[42].mxu1 %vm162_vm1, %v129_v29 }
  0x61   :  { %1980 = vmatprep.mubr.msk.f32.mxu0 %vm162_vm1, %v58_v30  ;;  %2088 = vmatprep.mubr.msk.f32.mxu1 %vm162_vm1, %v130_v31 }
  0x64   :  { %1981 = vmatmul.mubr.msk.f32.gmra.mrb[44].mxu0 %vm162_vm1, %v59_v32  ;;  %2089 = vmatmul.mubr.msk.f32.gmra.mrb[44].mxu1 %vm162_vm1, %v131_v33 }
  0x65   :  { %1983 = vmatprep.mubr.msk.f32.mxu0 %vm162_vm1, %v60_v34  ;;  %2091 = vmatprep.mubr.msk.f32.mxu1 %vm162_vm1, %v132_v35 }
  0x68   :  { %1984 = vmatmul.mubr.msk.f32.gmra.mrb[46].mxu0 %vm162_vm1, %v61_v36  ;;  %2092 = vmatmul.mubr.msk.f32.gmra.mrb[46].mxu1 %vm162_vm1, %v133_v37 }
  0x69   :  { %1986 = vmatprep.mubr.msk.f32.mxu0 %vm162_vm1, %v62_v38  ;;  %2094 = vmatprep.mubr.msk.f32.mxu1 %vm162_vm1, %v134_v39 }
  0x6c   :  { %1987 = vmatmul.mubr.msk.f32.gmra.mrb[48].mxu0 %vm162_vm1, %v63_v40  ;;  %2095 = vmatmul.mubr.msk.f32.gmra.mrb[48].mxu1 %vm162_vm1, %v135_v41 }
  0x6d   :  { %1989 = vmatprep.mubr.msk.f32.mxu0 %vm162_vm1, %v64_v42  ;;  %2097 = vmatprep.mubr.msk.f32.mxu1 %vm162_vm1, %v136_v43 }
  0x70   :  { %1990 = vmatmul.mubr.msk.f32.gmra.mrb[50].mxu0 %vm162_vm1, %v65_v44  ;;  %2098 = vmatmul.mubr.msk.f32.gmra.mrb[50].mxu1 %vm162_vm1, %v137_v45 }
  0x71   :  { %1992 = vmatprep.mubr.msk.f32.mxu0 %vm162_vm1, %v66_v46  ;;  %2100 = vmatprep.mubr.msk.f32.mxu1 %vm162_vm1, %v138_v47 }
  0x74   :  { %1993 = vmatmul.mubr.msk.f32.gmra.mrb[52].mxu0 %vm162_vm1, %v67_v48  ;;  %2101 = vmatmul.mubr.msk.f32.gmra.mrb[52].mxu1 %vm162_vm1, %v139_v49 }
  0x75   :  { %1995 = vmatprep.mubr.msk.f32.mxu0 %vm162_vm1, %v68_v50  ;;  %2103 = vmatprep.mubr.msk.f32.mxu1 %vm162_vm1, %v140_v51 }
  0x78   :  { %1996 = vmatmul.mubr.msk.f32.gmra.mrb[54].mxu0 %vm162_vm1, %v69_v52  ;;  %2104 = vmatmul.mubr.msk.f32.gmra.mrb[54].mxu1 %vm162_vm1, %v141_v53 }
  0x79   :  { %1998 = vmatprep.mubr.msk.f32.mxu0 %vm162_vm1, %v70_v54  ;;  %2106 = vmatprep.mubr.msk.f32.mxu1 %vm162_vm1, %v142_v55 }
  0x7c   :  { %1999 = vmatmul.mubr.msk.f32.gmra.mrb[56].mxu0 %vm162_vm1, %v71_v56  ;;  %2107 = vmatmul.mubr.msk.f32.gmra.mrb[56].mxu1 %vm162_vm1, %v143_v57 }
  0x7d   :  { %2001 = vmatprep.mubr.msk.f32.mxu0 %vm162_vm1, %v72_v58  ;;  %2109 = vmatprep.mubr.msk.f32.mxu1 %vm162_vm1, %v144_v59 }
  0x80   :  { %2002 = vmatmul.mubr.msk.f32.gmra.mrb[58].mxu0 %vm162_vm1, %v73_v60  ;;  %2110 = vmatmul.mubr.msk.f32.gmra.mrb[58].mxu1 %vm162_vm1, %v145_v61 }
  0x81   :  { %2004 = vmatprep.mubr.msk.f32.mxu0 %vm162_vm1, %v74_v62  ;;  %2112 = vmatprep.mubr.msk.f32.mxu1 %vm162_vm1, %v146_v63 }
  0x84   :  { %2005 = vmatmul.mubr.msk.f32.gmra.mrb[60].mxu0 %vm162_vm1, %v75_v0  ;;  %2113 = vmatmul.mubr.msk.f32.gmra.mrb[60].mxu1 %vm162_vm1, %v147_v1 }
  0x85   :  { %2007 = vmatprep.mubr.msk.f32.mxu0 %vm162_vm1, %v76_v2  ;;  %2115 = vmatprep.mubr.msk.f32.mxu1 %vm162_vm1, %v148_v3 }
  0x88   :  { %2008 = vmatmul.mubr.msk.f32.gmra.mrb[62].mxu0 %vm162_vm1, %v77_v4  ;;  %2116 = vmatmul.mubr.msk.f32.gmra.mrb[62].mxu1 %vm162_vm1, %v149_v5 }
  0x89   :  { %2010 = vmatprep.mubr.msk.f32.mxu0 %vm162_vm1, %v78_v6  ;;  %2118 = vmatprep.mubr.msk.f32.mxu1 %vm162_vm1, %v150_v7 }
  0x8c   :  { %2011 = vmatmul.mubr.msk.f32.gmra.mrb[64].mxu0 %vm162_vm1, %v79_v8  ;;  %2119 = vmatmul.mubr.msk.f32.gmra.mrb[64].mxu1 %vm162_vm1, %v151_v9 }
  0x8d   :  { %2013 = vmatprep.mubr.msk.f32.mxu0 %vm162_vm1, %v80_v10  ;;  %2121 = vmatprep.mubr.msk.f32.mxu1 %vm162_vm1, %v152_v11 }
  0x90   :  { %2014 = vmatmul.mubr.msk.f32.gmra.mrb[66].mxu0 %vm162_vm1, %v81_v12  ;;  %2122 = vmatmul.mubr.msk.f32.gmra.mrb[66].mxu1 %vm162_vm1, %v153_v13 }
  0x91   :  { %2016 = vmatprep.mubr.msk.f32.mxu0 %vm162_vm1, %v82_v14  ;;  %2124 = vmatprep.mubr.msk.f32.mxu1 %vm162_vm1, %v154_v15 }
  0x94   :  { %2017 = vmatmul.mubr.msk.f32.gmra.mrb[68].mxu0 %vm162_vm1, %v83_v16  ;;  %2125 = vmatmul.mubr.msk.f32.gmra.mrb[68].mxu1 %vm162_vm1, %v155_v17 }
  0x95   :  { %2019 = vmatprep.mubr.msk.f32.mxu0 %vm162_vm1, %v84_v18  ;;  %2127 = vmatprep.mubr.msk.f32.mxu1 %vm162_vm1, %v156_v19 }
  0x98   :  { %2020 = vmatmul.mubr.msk.f32.gmra.mrb[70].mxu0 %vm162_vm1, %v85_v20  ;;  %2128 = vmatmul.mubr.msk.f32.gmra.mrb[70].mxu1 %vm162_vm1, %v157_v21 }
  0xdf   :  { %v2754_v22 = vpop.f32.mrb[0].mxu0  ;;  %v2756_v23 = vpop.f32.mrb[0].mxu1 }
  0xe0   :  { %v2758_v24 = vpop.f32.mrb[1].mxu0  ;;  %v2760_v25 = vpop.f32.mrb[1].mxu1 }
  0xe3   :  { %v2762_v26 = vpop.f32.mrb[2].mxu0  ;;  %v2764_v27 = vpop.f32.mrb[2].mxu1 }
  0xe4   :  { %v2766_v28 = vpop.f32.mrb[3].mxu0  ;;  %v2768_v29 = vpop.f32.mrb[3].mxu1 }
  0xe7   :  { %v2770_v30 = vpop.f32.mrb[4].mxu0  ;;  %v2772_v31 = vpop.f32.mrb[4].mxu1 }
  0xe8   :  { %v2774_v32 = vpop.f32.mrb[5].mxu0  ;;  %v2776_v33 = vpop.f32.mrb[5].mxu1 }
  0xeb   :  { %v2778_v34 = vpop.f32.mrb[6].mxu0  ;;  %v2780_v35 = vpop.f32.mrb[6].mxu1 }
  0xec   :  { %v2782_v36 = vpop.f32.mrb[7].mxu0  ;;  %v2784_v37 = vpop.f32.mrb[7].mxu1 }
  0xef   :  { %v2786_v38 = vpop.f32.mrb[8].mxu0  ;;  %v2788_v39 = vpop.f32.mrb[8].mxu1 }
  0xf0   :  { %3403 = vst [vmem:[#allocation2_spill] sm:$0xff] %v2786_v38  ;;  %3404 = vst [vmem:[#allocation3_spill] sm:$0xff] %v2788_v39  ;;  %v2790_v40 = vpop.f32.mrb[9].mxu0  ;;  %v2792_v41 = vpop.f32.mrb[9].mxu1 }
  0xf1   :  { %3405 = vst [vmem:[#allocation4_spill] sm:$0xff] %v2790_v40  ;;  %3406 = vst [vmem:[#allocation5_spill] sm:$0xff] %v2792_v41 }
  0xf3   :  { %v2794_v42 = vpop.f32.mrb[10].mxu0  ;;  %v2796_v43 = vpop.f32.mrb[10].mxu1 }
  0xf4   :  { %3407 = vst [vmem:[#allocation6_spill] sm:$0xff] %v2794_v42  ;;  %3408 = vst [vmem:[#allocation7_spill] sm:$0xff] %v2796_v43  ;;  %v2798_v44 = vpop.f32.mrb[11].mxu0  ;;  %v2800_v45 = vpop.f32.mrb[11].mxu1 }
  0xf5   :  { %3409 = vst [vmem:[#allocation8_spill] sm:$0xff] %v2798_v44  ;;  %3410 = vst [vmem:[#allocation9_spill] sm:$0xff] %v2800_v45 }
  0xf7   :  { %v2802_v46 = vpop.f32.mrb[12].mxu0  ;;  %v2804_v47 = vpop.f32.mrb[12].mxu1 }
  0xf8   :  { %3411 = vst [vmem:[#allocation10_spill] sm:$0xff] %v2802_v46  ;;  %3412 = vst [vmem:[#allocation11_spill] sm:$0xff] %v2804_v47  ;;  %v2806_v48 = vpop.f32.mrb[13].mxu0  ;;  %v2808_v49 = vpop.f32.mrb[13].mxu1 }
  0xf9   :  { %3413 = vst [vmem:[#allocation12_spill] sm:$0xff] %v2806_v48  ;;  %3414 = vst [vmem:[#allocation13_spill] sm:$0xff] %v2808_v49 }
  0xfb   :  { %v2810_v50 = vpop.f32.mrb[14].mxu0  ;;  %v2812_v51 = vpop.f32.mrb[14].mxu1 }
  0xfc   :  { %3415 = vst [vmem:[#allocation14_spill] sm:$0xff] %v2810_v50  ;;  %3416 = vst [vmem:[#allocation15_spill] sm:$0xff] %v2812_v51  ;;  %v2814_v52 = vpop.f32.mrb[15].mxu0  ;;  %v2816_v53 = vpop.f32.mrb[15].mxu1 }
  0xfd   :  { %3417 = vst [vmem:[#allocation16_spill] sm:$0xff] %v2814_v52  ;;  %3418 = vst [vmem:[#allocation17_spill] sm:$0xff] %v2816_v53 }
  0xff   :  { %v2818_v54 = vpop.f32.mrb[16].mxu0  ;;  %v2820_v55 = vpop.f32.mrb[16].mxu1 }
 0x100   :  { %3419 = vst [vmem:[#allocation18_spill] sm:$0xff] %v2818_v54  ;;  %3420 = vst [vmem:[#allocation19_spill] sm:$0xff] %v2820_v55  ;;  %v2822_v56 = vpop.f32.mrb[17].mxu0  ;;  %v2824_v57 = vpop.f32.mrb[17].mxu1 }
 0x101   :  { %3421 = vst [vmem:[#allocation20_spill] sm:$0xff] %v2822_v56  ;;  %3422 = vst [vmem:[#allocation21_spill] sm:$0xff] %v2824_v57 }
 0x103   :  { %v2826_v58 = vpop.f32.mrb[18].mxu0  ;;  %v2828_v59 = vpop.f32.mrb[18].mxu1 }
 0x104   :  { %v2834_v62 = vpop.f32.mrb[19].mxu0  ;;  %v2836_v63 = vpop.f32.mrb[19].mxu1 }
 0x107   :  { %v2842_v2 = vpop.f32.mrb[20].mxu0  ;;  %v2844_v3 = vpop.f32.mrb[20].mxu1 }
 0x108   :  { %v2850_v6 = vpop.f32.mrb[21].mxu0  ;;  %v2852_v7 = vpop.f32.mrb[21].mxu1 }
 0x10b   :  { %v2858_v10 = vpop.f32.mrb[22].mxu0  ;;  %v2860_v11 = vpop.f32.mrb[22].mxu1 }
 0x10c   :  { %v2866_v14 = vpop.f32.mrb[23].mxu0  ;;  %v2868_v15 = vpop.f32.mrb[23].mxu1 }
 0x10f   :  { %v2874_v18 = vpop.f32.mrb[24].mxu0  ;;  %v2876_v19 = vpop.f32.mrb[24].mxu1 }
 0x110   :  { %v2882_v13 = vpop.f32.mrb[25].mxu0  ;;  %v2884_v12 = vpop.f32.mrb[25].mxu1 }
 0x113   :  { %v2890_v9 = vpop.f32.mrb[26].mxu0  ;;  %v2892_v8 = vpop.f32.mrb[26].mxu1 }
 0x114   :  { %3423 = vst [vmem:[#allocation22_spill] sm:$0xff] %v2890_v9  ;;  %3424 = vst [vmem:[#allocation23_spill] sm:$0xff] %v2892_v8  ;;  %v2898_v5 = vpop.f32.mrb[27].mxu0  ;;  %v2900_v4 = vpop.f32.mrb[27].mxu1 }
 0x115   :  { %3425 = vst [vmem:[#allocation24_spill] sm:$0xff] %v2898_v5  ;;  %3426 = vst [vmem:[#allocation25_spill] sm:$0xff] %v2900_v4 }
 0x117   :  { %v2906_v1 = vpop.f32.mrb[28].mxu0  ;;  %v2908_v0 = vpop.f32.mrb[28].mxu1 }
 0x118   :  { %3427 = vst [vmem:[#allocation26_spill] sm:$0xff] %v2906_v1  ;;  %3428 = vst [vmem:[#allocation27_spill] sm:$0xff] %v2908_v0  ;;  %v2914_v61 = vpop.f32.mrb[29].mxu0  ;;  %v2916_v60 = vpop.f32.mrb[29].mxu1 }
 0x119   :  { %3429 = vst [vmem:[#allocation28_spill] sm:$0xff] %v2914_v61  ;;  %3430 = vst [vmem:[#allocation29_spill] sm:$0xff] %v2916_v60 }
 0x11b   :  { %v2922_v4 = vpop.f32.mrb[30].mxu0  ;;  %v2924_v41 = vpop.f32.mrb[30].mxu1 }
 0x11c   :  { %3431 = vst [vmem:[#allocation30_spill] sm:$0xff] %v2922_v4  ;;  %3432 = vst [vmem:[#allocation31_spill] sm:$0xff] %v2924_v41  ;;  %v2930_v0 = vpop.f32.mrb[31].mxu0  ;;  %v2932_v43 = vpop.f32.mrb[31].mxu1 }
 0x11d   :  { %3433 = vst [vmem:[#allocation32_spill] sm:$0xff] %v2930_v0  ;;  %3434 = vst [vmem:[#allocation33_spill] sm:$0xff] %v2932_v43 }
 0x11f   :  { %v2938_v60 = vpop.f32.mrb[32].mxu0  ;;  %v2940_v45 = vpop.f32.mrb[32].mxu1 }
 0x120   :  { %3435 = vst [vmem:[#allocation34_spill] sm:$0xff] %v2938_v60  ;;  %3436 = vst [vmem:[#allocation35_spill] sm:$0xff] %v2940_v45  ;;  %v2946_v41 = vpop.f32.mrb[33].mxu0  ;;  %v2948_v47 = vpop.f32.mrb[33].mxu1 }
 0x121   :  { %3437 = vst [vmem:[#allocation36_spill] sm:$0xff] %v2946_v41  ;;  %3438 = vst [vmem:[#allocation37_spill] sm:$0xff] %v2948_v47 }
 0x123   :  { %v2954_v43 = vpop.f32.mrb[34].mxu0  ;;  %v2956_v49 = vpop.f32.mrb[34].mxu1 }
 0x124   :  { %3439 = vst [vmem:[#allocation38_spill] sm:$0xff] %v2954_v43  ;;  %3440 = vst [vmem:[#allocation39_spill] sm:$0xff] %v2956_v49  ;;  %v2962_v45 = vpop.f32.mrb[35].mxu0  ;;  %v2964_v51 = vpop.f32.mrb[35].mxu1 }
 0x125   :  { %3441 = vst [vmem:[#allocation40_spill] sm:$0xff] %v2962_v45  ;;  %3442 = vst [vmem:[#allocation41_spill] sm:$0xff] %v2964_v51 }
 0x127   :  { %v1970_v47 = vpop.f32.mrb[36].mxu0  ;;  %v2078_v53 = vpop.f32.mrb[36].mxu1 }
 0x128   :  { %v845_v41 = vpop.f32.mrb[37].mxu0  ;;  %v1205_v52 = vpop.f32.mrb[37].mxu1 }
 0x12b   :  { %v2970_v60 = vpop.f32.mrb[38].mxu0  ;;  %v2972_v20 = vpop.f32.mrb[38].mxu1 }
 0x12c   :  { %v2974_v43 = vpop.f32.mrb[39].mxu0  ;;  %v2976_v21 = vpop.f32.mrb[39].mxu1 }
 0x12f   :  { %v2978_v49 = vpop.f32.mrb[40].mxu0  ;;  %v2980_v55 = vpop.f32.mrb[40].mxu1 }
 0x130   :  { %v2982_v16 = vpop.f32.mrb[41].mxu0  ;;  %v2984_v45 = vpop.f32.mrb[41].mxu1 }
 0x133   :  { %v2986_v17 = vpop.f32.mrb[42].mxu0  ;;  %v2988_v51 = vpop.f32.mrb[42].mxu1 }
 0x134   :  { %v2990_v57 = vpop.f32.mrb[43].mxu0  ;;  %v2992_v56 = vpop.f32.mrb[43].mxu1 }
 0x137   :  { %v2994_v54 = vpop.f32.mrb[44].mxu0  ;;  %v2996_v50 = vpop.f32.mrb[44].mxu1 }
 0x138   :  { %v2998_v0 = vpop.f32.mrb[45].mxu0  ;;  %v3000_v48 = vpop.f32.mrb[45].mxu1 }
 0x139   :  { %3443 = vst [vmem:[#allocation42_spill] sm:$0xff] %v2998_v0  ;;  %3444 = vst [vmem:[#allocation43_spill] sm:$0xff] %v3000_v48 }
 0x13b   :  { %v3002_v4 = vpop.f32.mrb[46].mxu0  ;;  %v3004_v46 = vpop.f32.mrb[46].mxu1 }
 0x13c   :  { %3445 = vst [vmem:[#allocation44_spill] sm:$0xff] %v3002_v4  ;;  %3446 = vst [vmem:[#allocation45_spill] sm:$0xff] %v3004_v46  ;;  %v3006_v61 = vpop.f32.mrb[47].mxu0  ;;  %v3008_v44 = vpop.f32.mrb[47].mxu1 }
 0x13d   :  { %3447 = vst [vmem:[#allocation46_spill] sm:$0xff] %v3006_v61  ;;  %3448 = vst [vmem:[#allocation47_spill] sm:$0xff] %v3008_v44 }
 0x13f   :  { %v3010_v1 = vpop.f32.mrb[48].mxu0  ;;  %v3012_v42 = vpop.f32.mrb[48].mxu1 }
 0x140   :  { %3449 = vst [vmem:[#allocation48_spill] sm:$0xff] %v3010_v1  ;;  %3450 = vst [vmem:[#allocation49_spill] sm:$0xff] %v3012_v42  ;;  %v3014_v5 = vpop.f32.mrb[49].mxu0  ;;  %v3016_v40 = vpop.f32.mrb[49].mxu1 }
 0x141   :  { %3451 = vst [vmem:[#allocation50_spill] sm:$0xff] %v3014_v5  ;;  %3452 = vst [vmem:[#allocation51_spill] sm:$0xff] %v3016_v40 }
 0x143   :  { %v3018_v8 = vpop.f32.mrb[50].mxu0  ;;  %v3020_v39 = vpop.f32.mrb[50].mxu1 }
 0x144   :  { %3453 = vst [vmem:[#allocation52_spill] sm:$0xff] %v3018_v8  ;;  %3454 = vst [vmem:[#allocation53_spill] sm:$0xff] %v3020_v39  ;;  %v3022_v9 = vpop.f32.mrb[51].mxu0  ;;  %v3024_v4 = vpop.f32.mrb[51].mxu1 }
 0x145   :  { %3455 = vst [vmem:[#allocation54_spill] sm:$0xff] %v3022_v9  ;;  %3456 = vst [vmem:[#allocation55_spill] sm:$0xff] %v3024_v4  ;;  %v3037_v9 = vld [vmem:[%s3361_s2] ss:$0 sm:$0xff] }
 0x147   :  { %v3026_v46 = vpop.f32.mrb[52].mxu0  ;;  %v3028_v61 = vpop.f32.mrb[52].mxu1 }
 0x148   :  { %3457 = vst [vmem:[#allocation56_spill] sm:$0xff] %v3026_v46  ;;  %3458 = vst [vmem:[#allocation57_spill] sm:$0xff] %v3028_v61  ;;  %v3030_v44 = vpop.f32.mrb[53].mxu0  ;;  %v3032_v1 = vpop.f32.mrb[53].mxu1  ;;  %v3461_v61 = vmax.f32 %v2754_v22, %v2826_v58 }
 0x149   :  { %3459 = vst [vmem:[#allocation58_spill] sm:$0xff] %v3030_v44  ;;  %3460 = vst [vmem:[#allocation59_spill] sm:$0xff] %v3032_v1  ;;  %v3462_v1 = vmax.f32 %v2756_v23, %v2828_v59 }
 0x14b   :  { %v1997_v42 = vpop.f32.mrb[54].mxu0  ;;  %v2105_v5 = vpop.f32.mrb[54].mxu1 }
 0x14c   :  { %v1421_v38 = vmax.f32 %v1970_v47, %v1997_v42  ;;  %v1439_v40 = vmax.f32 %v2078_v53, %v2105_v5  ;;  %v935_v48 = vpop.f32.mrb[55].mxu0  ;;  %v1295_v8 = vpop.f32.mrb[55].mxu1  ;;  %v3463_v42 = vmax.f32 %v2758_v24, %v2834_v62  ;;  %v3464_v53 = vmax.f32 %v2760_v25, %v2836_v63 }
 0x14d   :  { %v1420_v4 = vmax.f32 %v845_v41, %v935_v48  ;;  %v1438_v39 = vmax.f32 %v1205_v52, %v1295_v8 }
 0x14e   :  { %v1457_v46 = vmax.f32 %v3461_v61, %v1421_v38  ;;  %v1475_v44 = vmax.f32 %v3462_v1, %v1439_v40  ;;  %v3467_v1 = vmax.f32 %v2766_v28, %v2850_v6 }
 0x14f   :  { %v1456_v47 = vmax.f32 %v3463_v42, %v1420_v4  ;;  %v1474_v5 = vmax.f32 %v3464_v53, %v1438_v39  ;;  %v2000_v0 = vpop.f32.mrb[56].mxu0  ;;  %v2108_v41 = vpop.f32.mrb[56].mxu1  ;;  %v3469_v53 = vmax.f32 %v2770_v30, %v2858_v10 }
 0x150   :  { %v1500_v48 = vadd.f32 %v3037_v9, %v1457_v46  ;;  %v1518_v22 = vadd.f32 %v3037_v9, %v1475_v44  ;;  %v1423_v38 = vmax.f32 %v2970_v60, %v2000_v0  ;;  %v1441_v23 = vmax.f32 %v2972_v20, %v2108_v41  ;;  %v945_v40 = vpop.f32.mrb[57].mxu0  ;;  %v1305_v52 = vpop.f32.mrb[57].mxu1 }
 0x151   :  { %v1499_v58 = vadd.f32 %v3037_v9, %v1456_v47  ;;  %v1517_v24 = vadd.f32 %v3037_v9, %v1474_v5  ;;  %v1422_v59 = vmax.f32 %v2974_v43, %v945_v40  ;;  %v1440_v25 = vmax.f32 %v2976_v21, %v1305_v52 }
 0x152   :  { %v1536_v39 = vmax.f32 %v1500_v48, 0.0  ;;  %v1554_v61 = vmax.f32 %v1518_v22, 0.0  ;;  %v3465_v46 = vmax.f32 %v2762_v26, %v2842_v2  ;;  %v3466_v60 = vmax.f32 %v2764_v27, %v2844_v3 }
 0x153   :  { %v1535_v63 = vmax.f32 %v1499_v58, 0.0  ;;  %v1553_v0 = vmax.f32 %v1517_v24, 0.0  ;;  %v1458_v4 = vmax.f32 %v3467_v1, %v1422_v59  ;;  %v3468_v43 = vmax.f32 %v2768_v29, %v2852_v7  ;;  %v2003_v20 = vpop.f32.mrb[58].mxu0  ;;  %v2111_v21 = vpop.f32.mrb[58].mxu1 }
 0x154   :  { %v1459_v44 = vmax.f32 %v3465_v46, %v1423_v38  ;;  %v1477_v62 = vmax.f32 %v3466_v60, %v1441_v23  ;;  %1573 = vst.msk [vmem:[%s3362_s3 + $0x8] sm:$0xff] %vm1571_vm4, %v1536_v39  ;;  %1591 = vst.msk [vmem:[%s3362_s3 + $0x98] sm:$0xff] %vm1571_vm4, %v1554_v61  ;;  %v1425_v28 = vmax.f32 %v2978_v49, %v2003_v20  ;;  %v955_v2 = vpop.f32.mrb[59].mxu0  ;;  %v1315_v3 = vpop.f32.mrb[59].mxu1 }
 0x155   :  { %v1476_v8 = vmax.f32 %v3468_v43, %v1440_v25  ;;  %v1443_v29 = vmax.f32 %v2980_v55, %v2111_v21  ;;  %1572 = vst.msk [vmem:[%s3362_s3] sm:$0xff] %vm1571_vm4, %v1535_v63  ;;  %1590 = vst.msk [vmem:[%s3362_s3 + $0x90] sm:$0xff] %vm1571_vm4, %v1553_v0  ;;  %v1501_v6 = vadd.f32 %v3037_v9, %v1458_v4  ;;  %v3477_v4 = vld [vmem:[#allocation42_spill] sm:$0xff]  ;;  %v3478_v43 = vld [vmem:[#allocation43_spill] sm:$0xff] }
 0x156   :  { %v1502_v26 = vadd.f32 %v3037_v9, %v1459_v44  ;;  %v1520_v27 = vadd.f32 %v3037_v9, %v1477_v62  ;;  %v1424_v49 = vmax.f32 %v2982_v16, %v955_v2  ;;  %v1442_v55 = vmax.f32 %v2984_v45, %v1315_v3  ;;  %v3479_v21 = vld [vmem:[#allocation2_spill] sm:$0xff]  ;;  %v3483_v2 = vld [vmem:[#allocation23_spill] sm:$0xff] }
 0x157   :  { %v1519_v7 = vadd.f32 %v3037_v9, %v1476_v8  ;;  %v1461_v5 = vmax.f32 %v3469_v53, %v1425_v28  ;;  %v3470_v41 = vmax.f32 %v2772_v31, %v2860_v11  ;;  %v1537_v22 = vmax.f32 %v1501_v6, 0.0  ;;  %v2006_v52 = vpop.f32.mrb[60].mxu0  ;;  %v2114_v58 = vpop.f32.mrb[60].mxu1 }
 0x158   :  { %v1538_v42 = vmax.f32 %v1502_v26, 0.0  ;;  %v1556_v47 = vmax.f32 %v1520_v27, 0.0  ;;  %v3471_v23 = vmax.f32 %v2774_v32, %v2866_v14  ;;  %v3472_v16 = vmax.f32 %v2776_v33, %v2868_v15  ;;  %v965_v10 = vpop.f32.mrb[61].mxu0  ;;  %v1325_v11 = vpop.f32.mrb[61].mxu1  ;;  %v3480_v26 = vld [vmem:[#allocation22_spill] sm:$0xff] }
 0x159   :  { %v1479_v48 = vmax.f32 %v3470_v41, %v1443_v29  ;;  %v1555_v38 = vmax.f32 %v1519_v7, 0.0  ;;  %v1504_v30 = vadd.f32 %v3037_v9, %v1461_v5  ;;  %v1427_v32 = vmax.f32 %v2986_v17, %v2006_v52  ;;  %1574 = vst.msk [vmem:[%s3362_s3 + $0x10] sm:$0xff] %vm1571_vm4, %v1537_v22  ;;  %v3482_v29 = vld [vmem:[#allocation3_spill] sm:$0xff]  ;;  %v3488_v5 = vld [vmem:[#allocation5_spill] sm:$0xff] }
 0x15a   :  { %v1460_v40 = vmax.f32 %v3471_v23, %v1424_v49  ;;  %v1478_v45 = vmax.f32 %v3472_v16, %v1442_v55  ;;  %1575 = vst.msk [vmem:[%s3362_s3 + $0x18] sm:$0xff] %vm1571_vm4, %v1538_v42  ;;  %1593 = vst.msk [vmem:[%s3362_s3 + $0xa8] sm:$0xff] %vm1571_vm4, %v1556_v47  ;;  %v1445_v33 = vmax.f32 %v2988_v51, %v2114_v58  ;;  %v3485_v55 = vld [vmem:[#allocation4_spill] sm:$0xff]  ;;  %v3489_v41 = vld [vmem:[#allocation25_spill] sm:$0xff] }
 0x15b   :  { %v1522_v31 = vadd.f32 %v3037_v9, %v1479_v48  ;;  %1592 = vst.msk [vmem:[%s3362_s3 + $0xa0] sm:$0xff] %vm1571_vm4, %v1555_v38  ;;  %v1426_v17 = vmax.f32 %v2990_v57, %v965_v10  ;;  %v1444_v51 = vmax.f32 %v2992_v56, %v1325_v11  ;;  %v1540_v24 = vmax.f32 %v1504_v30, 0.0  ;;  %v2009_v0 = vpop.f32.mrb[62].mxu0  ;;  %v2117_v1 = vpop.f32.mrb[62].mxu1  ;;  %v3486_v42 = vld [vmem:[#allocation24_spill] sm:$0xff]  ;;  %v3492_v58 = vld [vmem:[#allocation45_spill] sm:$0xff] }
 0x15c   :  { %v1503_v14 = vadd.f32 %v3037_v9, %v1460_v40  ;;  %v1521_v15 = vadd.f32 %v3037_v9, %v1478_v45  ;;  %v3473_v25 = vmax.f32 %v2778_v34, %v2874_v18  ;;  %v3474_v61 = vmax.f32 %v2780_v35, %v2876_v19  ;;  %v3491_v45 = vld [vmem:[#allocation44_spill] sm:$0xff]  ;;  %v3493_v11 = vld [vmem:[#allocation46_spill] sm:$0xff] }
 0x15d   :  { %v1558_v59 = vmax.f32 %v1522_v31, 0.0  ;;  %v3475_v62 = vmax.f32 %v2782_v36, %v2882_v13  ;;  %v3476_v57 = vmax.f32 %v2784_v37, %v2884_v12  ;;  %1577 = vst.msk [vmem:[%s3362_s3 + $0x28] sm:$0xff] %vm1571_vm4, %v1540_v24  ;;  %v1429_v36 = vmax.f32 %v2994_v54, %v2009_v0  ;;  %v975_v12 = vpop.f32.mrb[63].mxu0  ;;  %v1335_v13 = vpop.f32.mrb[63].mxu1  ;;  %v3502_v0 = vld [vmem:[#allocation28_spill] sm:$0xff] }
 0x15e   :  { %v1463_v39 = vmax.f32 %v3473_v25, %v1427_v32  ;;  %v1481_v46 = vmax.f32 %v3474_v61, %v1445_v33  ;;  %v1539_v44 = vmax.f32 %v1503_v14, 0.0  ;;  %v1557_v60 = vmax.f32 %v1521_v15, 0.0  ;;  %v3494_v15 = vld [vmem:[#allocation47_spill] sm:$0xff]  ;;  %v3496_v25 = vld [vmem:[#allocation26_spill] sm:$0xff] }
 0x15f   :  { %v1462_v63 = vmax.f32 %v3475_v62, %v1426_v17  ;;  %v1480_v56 = vmax.f32 %v3476_v57, %v1444_v51  ;;  %1595 = vst.msk [vmem:[%s3362_s3 + $0xb8] sm:$0xff] %vm1571_vm4, %v1558_v59  ;;  %v1447_v37 = vmax.f32 %v2996_v50, %v2117_v1  ;;  %v1428_v54 = vmax.f32 %v3477_v4, %v975_v12  ;;  %v2012_v38 = vpop.f32.mrb[64].mxu0  ;;  %v2120_v23 = vpop.f32.mrb[64].mxu1  ;;  %v3495_v59 = vld [vmem:[#allocation6_spill] sm:$0xff] }
 0x160   :  { %v1506_v34 = vadd.f32 %v3037_v9, %v1463_v39  ;;  %v1524_v35 = vadd.f32 %v3037_v9, %v1481_v46  ;;  %1576 = vst.msk [vmem:[%s3362_s3 + $0x20] sm:$0xff] %vm1571_vm4, %v1539_v44  ;;  %1594 = vst.msk [vmem:[%s3362_s3 + $0xb0] sm:$0xff] %vm1571_vm4, %v1557_v60  ;;  %v1446_v50 = vmax.f32 %v3478_v43, %v1335_v13  ;;  %v985_v31 = vpop.f32.mrb[65].mxu0  ;;  %v1345_v32 = vpop.f32.mrb[65].mxu1  ;;  %v3498_v46 = vld [vmem:[#allocation7_spill] sm:$0xff] }
 0x161   :  { %v1505_v18 = vadd.f32 %v3037_v9, %v1462_v63  ;;  %v1523_v19 = vadd.f32 %v3037_v9, %v1480_v56  ;;  %v3481_v27 = vmax.f32 %v3479_v21, %v3480_v26  ;;  %v3484_v3 = vmax.f32 %v3482_v29, %v3483_v2  ;;  %v3499_v44 = vld [vmem:[#allocation27_spill] sm:$0xff]  ;;  %v3501_v56 = vld [vmem:[#allocation8_spill] sm:$0xff] }
 0x162   :  { %v1542_v8 = vmax.f32 %v1506_v34, 0.0  ;;  %v1560_v20 = vmax.f32 %v1524_v35, 0.0  ;;  %v3487_v47 = vmax.f32 %v3485_v55, %v3486_v42  ;;  %v3490_v48 = vmax.f32 %v3488_v5, %v3489_v41  ;;  %v3504_v35 = vld [vmem:[#allocation9_spill] sm:$0xff]  ;;  %v3510_v2 = vld [vmem:[#allocation51_spill] sm:$0xff]  ;;  %v3512_v55 = vld [vmem:[#allocation30_spill] sm:$0xff] }
 0x163   :  { %v1465_v28 = vmax.f32 %v3481_v27, %v1429_v36  ;;  %v1483_v6 = vmax.f32 %v3484_v3, %v1447_v37  ;;  %v1541_v7 = vmax.f32 %v1505_v18, 0.0  ;;  %v1559_v49 = vmax.f32 %v1523_v19, 0.0  ;;  %v3505_v36 = vld [vmem:[#allocation29_spill] sm:$0xff]  ;;  %v2015_v13 = vpop.f32.mrb[66].mxu0  ;;  %v2123_v18 = vpop.f32.mrb[66].mxu1  ;;  %v3515_v5 = vld [vmem:[#allocation31_spill] sm:$0xff] }
 0x164   :  { %v1464_v53 = vmax.f32 %v3487_v47, %v1428_v54  ;;  %v1482_v22 = vmax.f32 %v3490_v48, %v1446_v50  ;;  %1579 = vst.msk [vmem:[%s3362_s3 + $0x38] sm:$0xff] %vm1571_vm4, %v1542_v8  ;;  %1597 = vst.msk [vmem:[%s3362_s3 + $0xc8] sm:$0xff] %vm1571_vm4, %v1560_v20  ;;  %v1431_v52 = vmax.f32 %v3491_v45, %v2012_v38  ;;  %v3507_v54 = vld [vmem:[#allocation48_spill] sm:$0xff]  ;;  %v3508_v50 = vld [vmem:[#allocation49_spill] sm:$0xff]  ;;  %v995_v20 = vpop.f32.mrb[67].mxu0  ;;  %v1355_v21 = vpop.f32.mrb[67].mxu1 }
 0x165   :  { %v1508_v40 = vadd.f32 %v3037_v9, %v1465_v28  ;;  %v1526_v16 = vadd.f32 %v3037_v9, %v1483_v6  ;;  %v1449_v30 = vmax.f32 %v3492_v58, %v2120_v23  ;;  %1578 = vst.msk [vmem:[%s3362_s3 + $0x30] sm:$0xff] %vm1571_vm4, %v1541_v7  ;;  %1596 = vst.msk [vmem:[%s3362_s3 + $0xc0] sm:$0xff] %vm1571_vm4, %v1559_v49  ;;  %v3509_v28 = vld [vmem:[#allocation50_spill] sm:$0xff]  ;;  %v3517_v23 = vld [vmem:[#allocation12_spill] sm:$0xff] }
 0x166   :  { %v1507_v33 = vadd.f32 %v3037_v9, %v1464_v53  ;;  %v1525_v10 = vadd.f32 %v3037_v9, %v1482_v22  ;;  %v1430_v14 = vmax.f32 %v3493_v11, %v985_v31  ;;  %v1448_v17 = vmax.f32 %v3494_v15, %v1345_v32  ;;  %v3511_v49 = vld [vmem:[#allocation10_spill] sm:$0xff]  ;;  %v3514_v53 = vld [vmem:[#allocation11_spill] sm:$0xff]  ;;  %v3521_v58 = vld [vmem:[#allocation33_spill] sm:$0xff] }
 0x167   :  { %v1544_v51 = vmax.f32 %v1508_v40, 0.0  ;;  %v1562_v24 = vmax.f32 %v1526_v16, 0.0  ;;  %v3497_v39 = vmax.f32 %v3495_v59, %v3496_v25  ;;  %v3500_v60 = vmax.f32 %v3498_v46, %v3499_v44  ;;  %v3518_v40 = vld [vmem:[#allocation32_spill] sm:$0xff]  ;;  %v2018_v32 = vpop.f32.mrb[68].mxu0  ;;  %v3526_v44 = vld [vmem:[#allocation55_spill] sm:$0xff] }
 0x168   :  { %v1543_v63 = vmax.f32 %v1507_v33, 0.0  ;;  %v1561_v57 = vmax.f32 %v1525_v10, 0.0  ;;  %v3503_v1 = vmax.f32 %v3501_v56, %v3502_v0  ;;  %v3506_v37 = vmax.f32 %v3504_v35, %v3505_v36  ;;  %v2126_v33 = vpop.f32.mrb[68].mxu1  ;;  %v3528_v56 = vld [vmem:[#allocation34_spill] sm:$0xff]  ;;  %v3531_v35 = vld [vmem:[#allocation35_spill] sm:$0xff] }
 0x169   :  { %v1467_v61 = vmax.f32 %v3497_v39, %v1431_v52  ;;  %v1485_v62 = vmax.f32 %v3500_v60, %v1449_v30  ;;  %1581 = vst.msk [vmem:[%s3362_s3 + $0x48] sm:$0xff] %vm1571_vm4, %v1544_v51  ;;  %1599 = vst.msk [vmem:[%s3362_s3 + $0xd8] sm:$0xff] %vm1571_vm4, %v1562_v24  ;;  %v1433_v43 = vmax.f32 %v3507_v54, %v2015_v13  ;;  %v3520_v52 = vld [vmem:[#allocation13_spill] sm:$0xff]  ;;  %v1005_v24 = vpop.f32.mrb[69].mxu0  ;;  %v1365_v59 = vpop.f32.mrb[69].mxu1 }
 0x16a   :  { %v1466_v34 = vmax.f32 %v3503_v1, %v1430_v14  ;;  %v1484_v12 = vmax.f32 %v3506_v37, %v1448_v17  ;;  %v1451_v8 = vmax.f32 %v3508_v50, %v2123_v18  ;;  %1580 = vst.msk [vmem:[%s3362_s3 + $0x40] sm:$0xff] %vm1571_vm4, %v1543_v63  ;;  %1598 = vst.msk [vmem:[%s3362_s3 + $0xd0] sm:$0xff] %vm1571_vm4, %v1561_v57  ;;  %v3523_v14 = vld [vmem:[#allocation52_spill] sm:$0xff]  ;;  %v3524_v17 = vld [vmem:[#allocation53_spill] sm:$0xff] }
 0x16b   :  { %v1510_v19 = vadd.f32 %v3037_v9, %v1467_v61  ;;  %v1528_v4 = vadd.f32 %v3037_v9, %v1485_v62  ;;  %v1432_v29 = vmax.f32 %v3509_v28, %v995_v20  ;;  %v1450_v3 = vmax.f32 %v3510_v2, %v1355_v21  ;;  %v3525_v61 = vld [vmem:[#allocation54_spill] sm:$0xff]  ;;  %v3533_v18 = vld [vmem:[#allocation16_spill] sm:$0xff]  ;;  %v3537_v50 = vld [vmem:[#allocation37_spill] sm:$0xff]  ;;  %v2021_v21 = vpop.f32.mrb[70].mxu0 }
 0x16c   :  { %v1509_v26 = vadd.f32 %v3037_v9, %v1466_v34  ;;  %v1527_v27 = vadd.f32 %v3037_v9, %v1484_v12  ;;  %v3513_v42 = vmax.f32 %v3511_v49, %v3512_v55  ;;  %v3516_v41 = vmax.f32 %v3514_v53, %v3515_v5  ;;  %v3527_v57 = vld [vmem:[#allocation14_spill] sm:$0xff]  ;;  %v3530_v34 = vld [vmem:[#allocation15_spill] sm:$0xff] }
 0x16d   :  { %v1546_v6 = vmax.f32 %v1510_v19, 0.0  ;;  %v1564_v7 = vmax.f32 %v1528_v4, 0.0  ;;  %v3519_v16 = vmax.f32 %v3517_v23, %v3518_v40  ;;  %v3522_v30 = vmax.f32 %v3520_v52, %v3521_v58  ;;  %v3534_v19 = vld [vmem:[#allocation36_spill] sm:$0xff]  ;;  %v3542_v5 = vld [vmem:[#allocation59_spill] sm:$0xff]  ;;  %v3544_v23 = vld [vmem:[#allocation38_spill] sm:$0xff] }
 0x16e   :  { %v1469_v47 = vmax.f32 %v3513_v42, %v1433_v43  ;;  %v1487_v48 = vmax.f32 %v3516_v41, %v1451_v8  ;;  %v1545_v22 = vmax.f32 %v1509_v26, 0.0  ;;  %v1563_v38 = vmax.f32 %v1527_v27, 0.0  ;;  %v3536_v43 = vld [vmem:[#allocation17_spill] sm:$0xff]  ;;  %v2129_v26 = vpop.f32.mrb[70].mxu1  ;;  %v3547_v52 = vld [vmem:[#allocation39_spill] sm:$0xff] }
 0x16f   :  { %v1468_v45 = vmax.f32 %v3519_v16, %v1432_v29  ;;  %v1486_v31 = vmax.f32 %v3522_v30, %v1450_v3  ;;  %1583 = vst.msk [vmem:[%s3362_s3 + $0x58] sm:$0xff] %vm1571_vm4, %v1546_v6  ;;  %1601 = vst.msk [vmem:[%s3362_s3 + $0xe8] sm:$0xff] %vm1571_vm4, %v1564_v7  ;;  %v1435_v15 = vmax.f32 %v3523_v14, %v2018_v32  ;;  %v3539_v29 = vld [vmem:[#allocation56_spill] sm:$0xff]  ;;  %v3540_v3 = vld [vmem:[#allocation57_spill] sm:$0xff]  ;;  %v1015_v7 = vpop.f32.mrb[71].mxu0  ;;  %v1375_v49 = vpop.f32.mrb[71].mxu1 }
 0x170   :  { %v1512_v10 = vadd.f32 %v3037_v9, %v1469_v47  ;;  %v1530_v11 = vadd.f32 %v3037_v9, %v1487_v48  ;;  %v1453_v51 = vmax.f32 %v3524_v17, %v2126_v33  ;;  %1582 = vst.msk [vmem:[%s3362_s3 + $0x50] sm:$0xff] %vm1571_vm4, %v1545_v22  ;;  %1600 = vst.msk [vmem:[%s3362_s3 + $0xe0] sm:$0xff] %vm1571_vm4, %v1563_v38  ;;  %v3541_v47 = vld [vmem:[#allocation58_spill] sm:$0xff]  ;;  %v3549_v33 = vld [vmem:[#allocation20_spill] sm:$0xff] }
 0x171   :  { %v1511_v25 = vadd.f32 %v3037_v9, %v1468_v45  ;;  %v1529_v39 = vadd.f32 %v3037_v9, %v1486_v31  ;;  %v1434_v46 = vmax.f32 %v3525_v61, %v1005_v24  ;;  %v1452_v60 = vmax.f32 %v3526_v44, %v1365_v59  ;;  %v3543_v38 = vld [vmem:[#allocation18_spill] sm:$0xff]  ;;  %v3546_v45 = vld [vmem:[#allocation19_spill] sm:$0xff]  ;;  %v3553_v17 = vld [vmem:[#allocation41_spill] sm:$0xff] }
 0x172   :  { %v1548_v62 = vmax.f32 %v1512_v10, 0.0  ;;  %v1566_v63 = vmax.f32 %v1530_v11, 0.0  ;;  %v3529_v0 = vmax.f32 %v3527_v57, %v3528_v56  ;;  %v3532_v36 = vmax.f32 %v3530_v34, %v3531_v35  ;;  %v3550_v10 = vld [vmem:[#allocation40_spill] sm:$0xff] }
 0x173   :  { %v1547_v12 = vmax.f32 %v1511_v25, 0.0  ;;  %v1565_v13 = vmax.f32 %v1529_v39, 0.0  ;;  %v3535_v4 = vmax.f32 %v3533_v18, %v3534_v19  ;;  %v3538_v8 = vmax.f32 %v3536_v43, %v3537_v50 }
 0x174   :  { %v1471_v1 = vmax.f32 %v3529_v0, %v1435_v15  ;;  %v1489_v37 = vmax.f32 %v3532_v36, %v1453_v51  ;;  %1585 = vst.msk [vmem:[%s3362_s3 + $0x68] sm:$0xff] %vm1571_vm4, %v1548_v62  ;;  %1603 = vst.msk [vmem:[%s3362_s3 + $0xf8] sm:$0xff] %vm1571_vm4, %v1566_v63  ;;  %v1437_v2 = vmax.f32 %v3539_v29, %v2021_v21  ;;  %v3552_v15 = vld [vmem:[#allocation21_spill] sm:$0xff] }
 0x175   :  { %v1470_v54 = vmax.f32 %v3535_v4, %v1434_v46  ;;  %v1488_v20 = vmax.f32 %v3538_v8, %v1452_v60  ;;  %v1455_v6 = vmax.f32 %v3540_v3, %v2129_v26  ;;  %1584 = vst.msk [vmem:[%s3362_s3 + $0x60] sm:$0xff] %vm1571_vm4, %v1547_v12  ;;  %1602 = vst.msk [vmem:[%s3362_s3 + $0xf0] sm:$0xff] %vm1571_vm4, %v1565_v13 }
 0x176   :  { %v1514_v27 = vadd.f32 %v3037_v9, %v1471_v1  ;;  %v1532_v28 = vadd.f32 %v3037_v9, %v1489_v37  ;;  %v1436_v53 = vmax.f32 %v3541_v47, %v1015_v7  ;;  %v1454_v41 = vmax.f32 %v3542_v5, %v1375_v49 }
 0x177   :  { %v1513_v55 = vadd.f32 %v3037_v9, %v1470_v54  ;;  %v1531_v42 = vadd.f32 %v3037_v9, %v1488_v20  ;;  %v3545_v40 = vmax.f32 %v3543_v38, %v3544_v23  ;;  %v3548_v58 = vmax.f32 %v3546_v45, %v3547_v52 }
 0x178   :  { %v1550_v48 = vmax.f32 %v1514_v27, 0.0  ;;  %v1568_v22 = vmax.f32 %v1532_v28, 0.0  ;;  %v3551_v11 = vmax.f32 %v3549_v33, %v3550_v10  ;;  %v3554_v51 = vmax.f32 %v3552_v15, %v3553_v17 }
 0x179   :  { %v1473_v16 = vmax.f32 %v3545_v40, %v1437_v2  ;;  %v1491_v30 = vmax.f32 %v3548_v58, %v1455_v6  ;;  %v1549_v31 = vmax.f32 %v1513_v55, 0.0  ;;  %v1567_v32 = vmax.f32 %v1531_v42, 0.0 }
 0x17a   :  { %v1472_v14 = vmax.f32 %v3551_v11, %v1436_v53  ;;  %v1490_v24 = vmax.f32 %v3554_v51, %v1454_v41  ;;  %1587 = vst.msk [vmem:[%s3362_s3 + $0x78] sm:$0xff] %vm1571_vm4, %v1550_v48  ;;  %1605 = vst.msk [vmem:[%s3362_s3 + $0x108] sm:$0xff] %vm1571_vm4, %v1568_v22 }
 0x17b   :  { %v1516_v59 = vadd.f32 %v3037_v9, %v1473_v16  ;;  %v1534_v25 = vadd.f32 %v3037_v9, %v1491_v30  ;;  %1586 = vst.msk [vmem:[%s3362_s3 + $0x70] sm:$0xff] %vm1571_vm4, %v1549_v31  ;;  %1604 = vst.msk [vmem:[%s3362_s3 + $0x100] sm:$0xff] %vm1571_vm4, %v1567_v32 }
 0x17c   :  { %v1515_v39 = vadd.f32 %v3037_v9, %v1472_v14  ;;  %v1533_v61 = vadd.f32 %v3037_v9, %v1490_v24 }
 0x17d   :  { %v1552_v46 = vmax.f32 %v1516_v59, 0.0  ;;  %v1570_v44 = vmax.f32 %v1534_v25, 0.0 }
 0x17e   :  { %v1551_v60 = vmax.f32 %v1515_v39, 0.0  ;;  %v1569_v62 = vmax.f32 %v1533_v61, 0.0 }
 0x17f   :  { %1589 = vst.msk [vmem:[%s3362_s3 + $0x88] sm:$0xff] %vm1571_vm4, %v1552_v46  ;;  %1607 = vst.msk [vmem:[%s3362_s3 + $0x118] sm:$0xff] %vm1571_vm4, %v1570_v44 }
 0x180   :  { %1588 = vst.msk [vmem:[%s3362_s3 + $0x80] sm:$0xff] %vm1571_vm4, %v1551_v60  ;;  %1606 = vst.msk [vmem:[%s3362_s3 + $0x110] sm:$0xff] %vm1571_vm4, %v1569_v62 }

// kernel: net_forward.3
= control target key start
LH: loop header
LB: loop body
LE: loop exit
PB: predicated region body
PF: predicated region fallthrough
CT: control target
= control target key end

     0   :  { %vm85_vm0 = vcmask 998400   ;;  %s2715_s0 = inlined_call_operand.vmem [shape: f32[2,4,16,250], index: 0, kind: input, shape index: {}]   ;;  %s2716_s1 = inlined_call_operand.vmem [shape: f32[250,20], index: 1, kind: input, shape index: {}]   ;;  %s2717_s2 = inlined_call_operand.vmem [shape: f32[1,20], index: 2, kind: input, shape index: {}]   ;;  %s2718_s3 = inlined_call_operand.vmem [shape: f32[16,20,128], index: 3, kind: input, shape index: {}]   ;;  %s2719_s4 = inlined_call_operand.vmem [shape: f32[1,128], index: 4, kind: input, shape index: {}]   ;;  %s2720_s5 = inlined_call_operand.hbm [shape: f32[2,128], index: 5, kind: output, shape index: {}]  }
   0x1   :  { %v69_v0 = vld [vmem:[%s2716_s1 + $0x80] sm:$0xff]  ;;  %v70_v1 = vld [vmem:[%s2716_s1 + $0x88] sm:$0xff]  ;;  %v71_v5 = vld [vmem:[%s2716_s1 + $0x90] sm:$0xff] }
   0x2   :  { %v53_v2 = vld [vmem:[%s2716_s1] sm:$0xff]  ;;  %v2045_v3 = vpack.c.bf16 %v70_v1, %v69_v0  ;;  %v54_v4 = vld [vmem:[%s2716_s1 + $0x8] sm:$0xff]  ;;  %v72_v6 = vld [vmem:[%s2716_s1 + $0x98] sm:$0xff] }
   0x3   :  { %v2047_v7 = vpack.c.bf16 %v54_v4, %v53_v2  ;;  %v2049_v8 = vpack.c.bf16 %v72_v6, %v71_v5  ;;  %v55_v9 = vld [vmem:[%s2716_s1 + $0x10] sm:$0xff]  ;;  %v56_v10 = vld [vmem:[%s2716_s1 + $0x18] sm:$0xff]  ;;  %v73_v11 = vld [vmem:[%s2716_s1 + $0xa0] sm:$0xff] }
   0x4   :  { %2046 = vmatprep.subr.bf16.mxu0 %v2045_v3  ;;  %v74_v12 = vld [vmem:[%s2716_s1 + $0xa8] sm:$0xff]  ;;  %v2051_v13 = vpack.c.bf16 %v56_v10, %v55_v9  ;;  %v57_v15 = vld [vmem:[%s2716_s1 + $0x20] sm:$0xff]  ;;  %v75_v17 = vld [vmem:[%s2716_s1 + $0xb0] sm:$0xff] }
   0x5   :  { %2048 = vmatpush3.bf16.msra.mxu0 %v2047_v7  ;;  %v2053_v14 = vpack.c.bf16 %v74_v12, %v73_v11  ;;  %v58_v16 = vld [vmem:[%s2716_s1 + $0x28] sm:$0xff]  ;;  %v76_v18 = vld [vmem:[%s2716_s1 + $0xb8] sm:$0xff]  ;;  %v59_v21 = vld [vmem:[%s2716_s1 + $0x30] sm:$0xff] }
   0x6   :  { %2050 = vmatprep.subr.bf16.mxu0 %v2049_v8  ;;  %v2055_v19 = vpack.c.bf16 %v58_v16, %v57_v15  ;;  %v2057_v20 = vpack.c.bf16 %v76_v18, %v75_v17  ;;  %v60_v22 = vld [vmem:[%s2716_s1 + $0x38] sm:$0xff]  ;;  %v77_v23 = vld [vmem:[%s2716_s1 + $0xc0] sm:$0xff]  ;;  %v78_v24 = vld [vmem:[%s2716_s1 + $0xc8] sm:$0xff] }
   0x7   :  { %v22_v25 = vld [vmem:[%s2715_s0 + $0x8] sm:$0xff]  ;;  %v2059_v26 = vpack.c.bf16 %v60_v22, %v59_v21  ;;  %v2061_v27 = vpack.c.bf16 %v78_v24, %v77_v23  ;;  %v61_v28 = vld [vmem:[%s2716_s1 + $0x40] sm:$0xff]  ;;  %v79_v30 = vld [vmem:[%s2716_s1 + $0xd0] sm:$0xff] }
   0x8   :  { %1662 = vmatprep.mubr.msk.f32.mxu0 %vm85_vm0, %v22_v25  ;;  %v62_v29 = vld [vmem:[%s2716_s1 + $0x48] sm:$0xff]  ;;  %v80_v31 = vld [vmem:[%s2716_s1 + $0xd8] sm:$0xff]  ;;  %v63_v34 = vld [vmem:[%s2716_s1 + $0x50] sm:$0xff] }
   0x9   :  { %2052 = vmatpush3.bf16.msra.mxu0 %v2051_v13  ;;  %v2063_v32 = vpack.c.bf16 %v62_v29, %v61_v28  ;;  %v2065_v33 = vpack.c.bf16 %v80_v31, %v79_v30  ;;  %v64_v35 = vld [vmem:[%s2716_s1 + $0x58] sm:$0xff]  ;;  %v81_v36 = vld [vmem:[%s2716_s1 + $0xe0] sm:$0xff]  ;;  %v82_v37 = vld [vmem:[%s2716_s1 + $0xe8] sm:$0xff] }
   0xa   :  { %2054 = vmatprep.subr.bf16.mxu0 %v2053_v14  ;;  %v2067_v38 = vpack.c.bf16 %v64_v35, %v63_v34  ;;  %v2069_v39 = vpack.c.bf16 %v82_v37, %v81_v36  ;;  %v65_v40 = vld [vmem:[%s2716_s1 + $0x60] sm:$0xff]  ;;  %v66_v41 = vld [vmem:[%s2716_s1 + $0x68] sm:$0xff] }
   0xd   :  { %2056 = vmatpush3.bf16.msra.mxu0 %v2055_v19 }
   0xe   :  { %2058 = vmatprep.subr.bf16.mxu0 %v2057_v20 }
  0x11   :  { %2060 = vmatpush3.bf16.msra.mxu0 %v2059_v26 }
  0x12   :  { %2062 = vmatprep.subr.bf16.mxu0 %v2061_v27 }
  0x15   :  { %2064 = vmatpush3.bf16.msra.mxu0 %v2063_v32 }
  0x16   :  { %2066 = vmatprep.subr.bf16.mxu0 %v2065_v33 }
  0x17   :  { %10 = vsyncpa [#allocation3], 0  ;;  %v83_v42 = vld [vmem:[%s2716_s1 + $0xf0] sm:$0xff]  ;;  %v84_v43 = vld [vmem:[%s2716_s1 + $0xf8] sm:$0x3]  ;;  %vm134_vm1 = vcmask 1041408   ;;  %v2071_v44 = vpack.c.bf16 %v66_v41, %v65_v40 }
  0x18   :  { %v2073_v45 = vpack.c.bf16 %v84_v43, %v83_v42  ;;  %v67_v46 = vld [vmem:[%s2716_s1 + $0x70] sm:$0xff]  ;;  %v68_v47 = vld [vmem:[%s2716_s1 + $0x78] sm:$0xff]  ;;  %vm2155_vm2 = vmmov 1   ;;  %v21_v49 = vld [vmem:[%s2715_s0] sm:$0xff]  ;;  %v2156_v19 = vmov 0.0|0.0   ;;  %v2157_v20 = vmov 0.0  }
  0x19   :  { %2068 = vmatpush3.bf16.msra.mxu0 %v2067_v38  ;;  %vm2074_vm3 = vmpackc.low %vm134_vm1, %vm2155_vm2  ;;  %v2076_v48 = vpack.c.bf16 %v68_v47, %v67_v46  ;;  %v24_v50 = vld [vmem:[%s2715_s0 + $0x18] sm:$0xff]  ;;  %v23_v51 = vld [vmem:[%s2715_s0 + $0x10] sm:$0xff]  ;;  %2078 = vmatprep.subr.bf16.mxu1 %v2156_v19  ;;  %vm325_vm4 = vcmask 1043456   ;;  %vm2158_vm5 = vmmov 0   ;;  %vm320_vm6 = vcmask 1041409   ;;  %s2159_s7 = smov [#allocation2]  }
  0x1a   :  { %2070 = vmatprep.subr.bf16.mxu0 %v2069_v39  ;;  %v26_v52 = vld [vmem:[%s2715_s0 + $0x28] sm:$0xff]  ;;  %v25_v53 = vld [vmem:[%s2715_s0 + $0x20] sm:$0xff]  ;;  %v28_v54 = vld [vmem:[%s2715_s0 + $0x38] sm:$0xff]  ;;  %1907 = vmatprep.mubr.msk.f32.mxu1 %vm2158_vm5, %v2157_v20  ;;  %vm322_vm7 = vcmask 162816   ;;  %s1653_s8 = sshll.u32 %s2159_s7, 4  ;;  %s1654_s8 = int_to_ptr.vmem [resolvable:$true] %s1653_s8 }
  0x1b   :  { %v27_v55 = vld [vmem:[%s2715_s0 + $0x30] sm:$0xff]  ;;  %v30_v56 = vld [vmem:[%s2715_s0 + $0x48] sm:$0xff]  ;;  %v29_v57 = vld [vmem:[%s2715_s0 + $0x40] sm:$0xff]  ;;  %s2131_s9 = scalar_lea.vmem %s1654_s8, 32  ;;  %p2136_p1 = scmp.lt.s32.totalorder %s1654_s8, %s1654_s8 }
  0x1c   :  { %v32_v58 = vld [vmem:[%s2715_s0 + $0x58] sm:$0xff]  ;;  %v31_v59 = vld [vmem:[%s2715_s0 + $0x50] sm:$0xff]  ;;  %v34_v60 = vld [vmem:[%s2715_s0 + $0x68] sm:$0xff]  ;;  %p2132_p0 = scmp.ne.s32.totalorder %s1654_s8, %s2131_s9  ;;  %p2137_p2 = scmp.lt.s32.totalorder %s2131_s9, %s2131_s9 }
  0x1d   :  { %2072 = vmatpush3.bf16.msra.mxu0 %v2071_v44  ;;  %v33_v61 = vld [vmem:[%s2715_s0 + $0x60] sm:$0xff]  ;;  %v36_v62 = vld [vmem:[%s2715_s0 + $0x78] sm:$0xff]  ;;  %v35_v63 = vld [vmem:[%s2715_s0 + $0x70] sm:$0xff] }
  0x1e   :  { %2075 = vmatprep.subr.msk.bf16.mxu0 %vm2074_vm3, %v2073_v45  ;;  %v38_v0 = vld [vmem:[%s2715_s0 + $0x88] sm:$0xff]  ;;  %v37_v1 = vld [vmem:[%s2715_s0 + $0x80] sm:$0xff]  ;;  %v40_v2 = vld [vmem:[%s2715_s0 + $0x98] sm:$0xff]  ;;  %p2138_p3 = por %p2137_p2, %p2136_p1 }
  0x1f   :  { %v39_v3 = vld [vmem:[%s2715_s0 + $0x90] sm:$0xff]  ;;  %v42_v4 = vld [vmem:[%s2715_s0 + $0xa8] sm:$0xff]  ;;  %v41_v5 = vld [vmem:[%s2715_s0 + $0xa0] sm:$0xff] }
  0x20   :  { %v44_v6 = vld [vmem:[%s2715_s0 + $0xb8] sm:$0xff]  ;;  %v43_v7 = vld [vmem:[%s2715_s0 + $0xb0] sm:$0xff]  ;;  %v46_v8 = vld [vmem:[%s2715_s0 + $0xc8] sm:$0xff]  ;;  %p2139_p4 = pnand %p2138_p3, %p2132_p0 }
  0x21   :  { %2077 = vmatpush3.bf16.msra.mxu0 %v2076_v48  ;;  %v45_v9 = vld [vmem:[%s2715_s0 + $0xc0] sm:$0xff]  ;;  %v48_v10 = vld [vmem:[%s2715_s0 + $0xd8] sm:$0xff]  ;;  %v47_v11 = vld [vmem:[%s2715_s0 + $0xd0] sm:$0xff] }
  0x22   :  { %v50_v12 = vld [vmem:[%s2715_s0 + $0xe8] sm:$0xff]  ;;  %v49_v13 = vld [vmem:[%s2715_s0 + $0xe0] sm:$0xff]  ;;  %v52_v14 = vld [vmem:[%s2715_s0 + $0xf8] sm:$0xff]  ;;  %2123 = vmatprep.subr.bf16.mxu0 %v2156_v19 }
  0x23   :  { %v51_v15 = vld [vmem:[%s2715_s0 + $0xf0] sm:$0xff]  ;;  %v1679_v16 = vld [vmem:[%s2718_s3 + $0x18] sm:$0xff]  ;;  %v1680_v17 = vld [vmem:[%s2718_s3 + $0x20] sm:$0xff] }
  0x24   :  { %203 = vmatmul.mubr.f32.vlgmr.msra.gmra.mrb[0].mxu0 %v21_v49  ;;  %v2079_v18 = vpack.c.bf16 %v1680_v17, %v1679_v16  ;;  %v1681_v21 = vld [vmem:[%s2718_s3 + $0x28] sm:$0xf]  ;;  %v1752_v23 = vld [vmem:[%s2718_s3 + $0x170] sm:$0xff]  ;;  %v1753_v25 = vld [vmem:[%s2718_s3 + $0x178] sm:$0xf] }
  0x25   :  { %1663 = vmatprep.mubr.msk.f32.mxu0 %vm85_vm0, %v24_v50  ;;  %v1751_v22 = vld [vmem:[%s2718_s3 + $0x168] sm:$0xff] }
  0x26   :  { %2080 = vmatpush3.bf16.msra.mxu1 %v2079_v18  ;;  %v2124_v24 = vpack.c.bf16 %v1752_v23, %v1751_v22 }
  0x27   :  { %1905 = vmatprep.subr.mxu1 %v2157_v20 }
  0x28   :  { %208 = vmatmul.mubr.f32.gmra.mrb[2].mxu0 %v23_v51 }
  0x29   :  { %1664 = vmatprep.mubr.msk.f32.mxu0 %vm85_vm0, %v26_v52  ;;  %2125 = vmatpush3.bf16.msra.mxu0 %v2124_v24  ;;  %v311_v24 = vld [vmem:[%s2718_s3 + $0x8] sm:$0xff] }
  0x2a   :  { %1906 = vmatpush3.msk.msra.mxu1 %vm325_vm4, %v1681_v21  ;;  %2040 = vmatprep.subr.mxu0 %v2157_v20  ;;  %v310_v21 = vld [vmem:[%s2718_s3] sm:$0xff] }
  0x2b   :  { %2081 = vmatprep.subr.bf16.mxu1 %v2156_v19 }
  0x2c   :  { %213 = vmatmul.mubr.f32.gmra.mrb[4].mxu0 %v25_v53 }
  0x2d   :  { %1665 = vmatprep.mubr.msk.f32.mxu0 %vm85_vm0, %v28_v54  ;;  %2041 = vmatpush3.msk.msra.mxu0 %vm325_vm4, %v1753_v25  ;;  %v2439_v25 = vld [vmem:[%s2718_s3 + $0x30] sm:$0xff] }
  0x30   :  { %218 = vmatmul.mubr.f32.gmra.mrb[6].mxu0 %v27_v55 }
  0x31   :  { %1666 = vmatprep.mubr.msk.f32.mxu0 %vm85_vm0, %v30_v56 }
  0x34   :  { %223 = vmatmul.mubr.f32.gmra.mrb[8].mxu0 %v29_v57 }
  0x35   :  { %1667 = vmatprep.mubr.msk.f32.mxu0 %vm85_vm0, %v32_v58 }
  0x38   :  { %228 = vmatmul.mubr.f32.gmra.mrb[10].mxu0 %v31_v59 }
  0x39   :  { %1668 = vmatprep.mubr.msk.f32.mxu0 %vm85_vm0, %v34_v60 }
  0x3c   :  { %233 = vmatmul.mubr.f32.gmra.mrb[12].mxu0 %v33_v61 }
  0x3d   :  { %1669 = vmatprep.mubr.msk.f32.mxu0 %vm85_vm0, %v36_v62 }
  0x40   :  { %238 = vmatmul.mubr.f32.gmra.mrb[14].mxu0 %v35_v63 }
  0x41   :  { %1670 = vmatprep.mubr.msk.f32.mxu0 %vm85_vm0, %v38_v0 }
  0x44   :  { %243 = vmatmul.mubr.f32.gmra.mrb[16].mxu0 %v37_v1 }
  0x45   :  { %1671 = vmatprep.mubr.msk.f32.mxu0 %vm85_vm0, %v40_v2 }
  0x48   :  { %248 = vmatmul.mubr.f32.gmra.mrb[18].mxu0 %v39_v3 }
  0x49   :  { %1672 = vmatprep.mubr.msk.f32.mxu0 %vm85_vm0, %v42_v4 }
  0x4c   :  { %253 = vmatmul.mubr.f32.gmra.mrb[20].mxu0 %v41_v5 }
  0x4d   :  { %1673 = vmatprep.mubr.msk.f32.mxu0 %vm85_vm0, %v44_v6 }
  0x50   :  { %258 = vmatmul.mubr.f32.gmra.mrb[22].mxu0 %v43_v7 }
  0x51   :  { %1674 = vmatprep.mubr.msk.f32.mxu0 %vm85_vm0, %v46_v8 }
  0x54   :  { %263 = vmatmul.mubr.f32.gmra.mrb[24].mxu0 %v45_v9  ;;  %v1678_v9 = vld [vmem:[%s2717_s2] ss:$0 sm:$0xff] }
  0x55   :  { %1675 = vmatprep.mubr.msk.f32.mxu0 %vm85_vm0, %v48_v10 }
  0x58   :  { %268 = vmatmul.mubr.f32.gmra.mrb[26].mxu0 %v47_v11 }
  0x59   :  { %1676 = vmatprep.mubr.msk.f32.mxu0 %vm85_vm0, %v50_v12 }
  0x5c   :  { %273 = vmatmul.mubr.f32.gmra.mrb[28].mxu0 %v49_v13 }
  0x5d   :  { %1677 = vmatprep.mubr.msk.f32.mxu0 %vm85_vm0, %v52_v14 }
  0x60   :  { %278 = vmatmul.mubr.f32.gmra.mrb[30].mxu0 %v51_v15 }
  0x61   :  { %2042 = vmatprep.mubr.msk.f32.mxu0 %vm2158_vm5, %v2157_v20 }
  0xf7   :  { %v1789_v26 = vpop.f32.mrb[0].mxu0 }
  0xf8   :  { %v1790_v27 = vpop.f32.mrb[1].mxu0 }
  0xf9   :  { %v1791_v28 = vadd.f32 %v1790_v27, %v1789_v26  ;;  %v2444_v26 = vld [vmem:[%s2718_s3 + $0x38] sm:$0xff] }
  0xfb   :  { %v1792_v29 = vpop.f32.mrb[2].mxu0 }
  0xfc   :  { %v1793_v30 = vpop.f32.mrb[3].mxu0 }
  0xfd   :  { %v1794_v31 = vadd.f32 %v1793_v30, %v1792_v29 }
  0xff   :  { %v1795_v32 = vpop.f32.mrb[4].mxu0 }
 0x100   :  { %v1796_v33 = vpop.f32.mrb[5].mxu0 }
 0x101   :  { %v1797_v34 = vadd.f32 %v1796_v33, %v1795_v32  ;;  %v2082_v32 = vpack.c.bf16 %v311_v24, %v310_v21  ;;  %v2085_v33 = vpack.c.bf16 %v2444_v26, %v2439_v25  ;;  %v1688_v24 = vld [vmem:[%s2718_s3 + $0x40] sm:$0xf] }
 0x102   :  { %v1696_v26 = vld [vmem:[%s2718_s3 + $0x60] sm:$0xff] }
 0x103   :  { %v283_v35 = vmax.f32 %v1791_v28, %v1797_v34  ;;  %v1798_v36 = vpop.f32.mrb[6].mxu0 }
 0x104   :  { %v1799_v37 = vpop.f32.mrb[7].mxu0 }
 0x105   :  { %v1800_v38 = vadd.f32 %v1799_v37, %v1798_v36 }
 0x107   :  { %v284_v39 = vmax.f32 %v1794_v31, %v1800_v38  ;;  %v1801_v40 = vpop.f32.mrb[8].mxu0 }
 0x108   :  { %v1802_v41 = vpop.f32.mrb[9].mxu0 }
 0x109   :  { %v1803_v42 = vadd.f32 %v1802_v41, %v1801_v40 }
 0x10b   :  { %v1804_v43 = vpop.f32.mrb[10].mxu0 }
 0x10c   :  { %v1805_v44 = vpop.f32.mrb[11].mxu0 }
 0x10d   :  { %v1806_v45 = vadd.f32 %v1805_v44, %v1804_v43 }
 0x10f   :  { %v1807_v46 = vpop.f32.mrb[12].mxu0 }
 0x110   :  { %v1808_v47 = vpop.f32.mrb[13].mxu0 }
 0x111   :  { %v1809_v48 = vadd.f32 %v1808_v47, %v1807_v46 }
 0x113   :  { %v287_v49 = vmax.f32 %v1803_v42, %v1809_v48  ;;  %v1810_v50 = vpop.f32.mrb[14].mxu0 }
 0x114   :  { %v1811_v51 = vpop.f32.mrb[15].mxu0 }
 0x115   :  { %v291_v52 = vmax.f32 %v283_v35, %v287_v49  ;;  %v1812_v53 = vadd.f32 %v1811_v51, %v1810_v50 }
 0x117   :  { %v288_v54 = vmax.f32 %v1806_v45, %v1812_v53  ;;  %v1813_v55 = vpop.f32.mrb[16].mxu0  ;;  %v302_v13 = vadd.f32 %v1678_v9, %v291_v52 }
 0x118   :  { %v1814_v56 = vpop.f32.mrb[17].mxu0 }
 0x119   :  { %v292_v57 = vmax.f32 %v284_v39, %v288_v54  ;;  %v1815_v58 = vadd.f32 %v1814_v56, %v1813_v55  ;;  %v306_v18 = vmax.f32 %v302_v13, 0.0 }
 0x11b   :  { %v1816_v59 = vpop.f32.mrb[18].mxu0  ;;  %v303_v16 = vadd.f32 %v1678_v9, %v292_v57  ;;  %v319_v31 = vrot.slane %v306_v18, 1  ;;  %v480_v36 = vrot.slane %v306_v18, 2  ;;  %v563_v37 = vrot.slane %v306_v18, 3 }
 0x11c   :  { %v1817_v60 = vpop.f32.mrb[19].mxu0  ;;  %v646_v38 = vrot.slane %v306_v18, 4  ;;  %v729_v39 = vrot.slane %v306_v18, 5  ;;  %v812_v40 = vrot.slane %v306_v18, 6  ;;  %v895_v41 = vrot.slane %v306_v18, 7 }
 0x11d   :  { %v1818_v61 = vadd.f32 %v1817_v60, %v1816_v59  ;;  %v2446_v28 = vmax.f32 %v303_v16, 0.0  ;;  %v1692_v16 = vld [vmem:[%s2718_s3 + $0x50] sm:$0xff] }
 0x11f   :  { %v1819_v62 = vpop.f32.mrb[20].mxu0  ;;  %v1559_v44 = vrot.slane %v2446_v28, 7  ;;  %v1062_v45 = vrot.slane %v2446_v28, 1  ;;  %v1144_v46 = vrot.slane %v2446_v28, 2  ;;  %v1227_v47 = vrot.slane %v2446_v28, 3 }
 0x120   :  { %v1820_v63 = vpop.f32.mrb[21].mxu0  ;;  %v1310_v48 = vrot.slane %v2446_v28, 4  ;;  %v1393_v49 = vrot.slane %v2446_v28, 5  ;;  %v1476_v13 = vrot.slane %v2446_v28, 6 }
 0x121   :  { %v1821_v0 = vadd.f32 %v1820_v63, %v1819_v62  ;;  %v312_v62 = vld [vmem:[%s2718_s3 + $0x10] sm:$0xf] }
 0x123   :  { %v285_v1 = vmax.f32 %v1815_v58, %v1821_v0  ;;  %v1822_v2 = vpop.f32.mrb[22].mxu0 }
 0x124   :  { %v1823_v3 = vpop.f32.mrb[23].mxu0 }
 0x125   :  { %v1824_v4 = vadd.f32 %v1823_v3, %v1822_v2 }
 0x127   :  { %v286_v5 = vmax.f32 %v1818_v61, %v1824_v4  ;;  %v1825_v6 = vpop.f32.mrb[24].mxu0 }
 0x128   :  { %v1826_v7 = vpop.f32.mrb[25].mxu0 }
 0x129   :  { %v1827_v8 = vadd.f32 %v1826_v7, %v1825_v6 }
 0x12b   :  { %v1828_v10 = vpop.f32.mrb[26].mxu0 }
 0x12c   :  { %v1829_v11 = vpop.f32.mrb[27].mxu0 }
 0x12d   :  { %v1830_v12 = vadd.f32 %v1829_v11, %v1828_v10 }
 0x12f   :  { %v1831_v14 = vpop.f32.mrb[28].mxu0 }
 0x130   :  { %v1832_v15 = vpop.f32.mrb[29].mxu0 }
 0x131   :  { %v1833_v17 = vadd.f32 %v1832_v15, %v1831_v14  ;;  %v1691_v15 = vld [vmem:[%s2718_s3 + $0x48] sm:$0xff] }
 0x132   :  { %v2088_v25 = vpack.c.bf16 %v1692_v16, %v1691_v15 }
 0x133   :  { %v289_v22 = vmax.f32 %v1827_v8, %v1833_v17  ;;  %v1834_v23 = vpop.f32.mrb[30].mxu0 }
 0x134   :  { %v1835_v27 = vpop.f32.mrb[31].mxu0 }
 0x135   :  { %v293_v29 = vmax.f32 %v285_v1, %v289_v22  ;;  %v1836_v30 = vadd.f32 %v1835_v27, %v1834_v23  ;;  %v1697_v27 = vld [vmem:[%s2718_s3 + $0x68] sm:$0xff] }
 0x137   :  { %v304_v34 = vadd.f32 %v1678_v9, %v293_v29  ;;  %v290_v35 = vmax.f32 %v1830_v12, %v1836_v30  ;;  %v2091_v29 = vpack.c.bf16 %v1697_v27, %v1696_v26  ;;  %v1701_v30 = vld [vmem:[%s2718_s3 + $0x78] sm:$0xff] }
 0x139   :  { %v308_v42 = vmax.f32 %v304_v34, 0.0  ;;  %v294_v43 = vmax.f32 %v286_v5, %v290_v35  ;;  %v1706_v34 = vld [vmem:[%s2718_s3 + $0x90] sm:$0xff]  ;;  %v1707_v35 = vld [vmem:[%s2718_s3 + $0x98] sm:$0xff] }
 0x13b   :  { %v305_v50 = vadd.f32 %v1678_v9, %v294_v43  ;;  %v321_v51 = vsel %vm320_vm6, %v308_v42, %v319_v31  ;;  %v399_v52 = vrot.slane %v308_v42, 7  ;;  %v481_v53 = vrot.slane %v308_v42, 1  ;;  %v1702_v31 = vld [vmem:[%s2718_s3 + $0x80] sm:$0xff]  ;;  %v1717_v43 = vld [vmem:[%s2718_s3 + $0xc8] sm:$0xff] }
 0x13c   :  { %1908 = vmatmul.mubr.msk.f32.vlgmr.msra.gmra.mrb[0].mxu1 %vm322_vm7, %v321_v51  ;;  %v564_v54 = vrot.slane %v308_v42, 2  ;;  %v647_v55 = vrot.slane %v308_v42, 3  ;;  %v730_v56 = vrot.slane %v308_v42, 4  ;;  %v813_v57 = vrot.slane %v308_v42, 5  ;;  %v1727_v51 = vld [vmem:[%s2718_s3 + $0xf8] sm:$0xff] }
 0x13d   :  { %v309_v58 = vmax.f32 %v305_v50, 0.0  ;;  %2083 = vmatpush3.bf16.msra.mxu1 %v2082_v32  ;;  %1916 = vmatprep.mubr.msk.f32.mxu1 %vm2158_vm5, %v2157_v20  ;;  %v400_v59 = vsel %vm320_vm6, %v399_v52, %v306_v18  ;;  %v482_v60 = vsel %vm320_vm6, %v481_v53, %v480_v36  ;;  %v896_v61 = vrot.slane %v308_v42, 6  ;;  %v1698_v32 = vld [vmem:[%s2718_s3 + $0x70] sm:$0xf]  ;;  %v1703_v36 = vld [vmem:[%s2718_s3 + $0x88] sm:$0xf] }
 0x13e   :  { %1914 = vmatprep.subr.mxu1 %v2157_v20  ;;  %v565_v63 = vsel %vm320_vm6, %v564_v54, %v563_v37  ;;  %v648_v0 = vsel %vm320_vm6, %v647_v55, %v646_v38  ;;  %v731_v1 = vsel %vm320_vm6, %v730_v56, %v729_v39  ;;  %v2470_v2 = vsel %vm320_vm6, %v813_v57, %v812_v40  ;;  %v1711_v38 = vld [vmem:[%s2718_s3 + $0xa8] sm:$0xff]  ;;  %v1712_v39 = vld [vmem:[%s2718_s3 + $0xb0] sm:$0xff]  ;;  %v1708_v40 = vld [vmem:[%s2718_s3 + $0xa0] sm:$0xf] }
 0x13f   :  { %v1560_v3 = vrot.slane %v309_v58, 6  ;;  %v2473_v4 = vsel %vm320_vm6, %v896_v61, %v895_v41  ;;  %v980_v5 = vrot.slane %v309_v58, 7  ;;  %v2476_v6 = vsel %vm320_vm6, %v309_v58, %v1062_v45  ;;  %v1716_v42 = vld [vmem:[%s2718_s3 + $0xc0] sm:$0xff]  ;;  %v1726_v50 = vld [vmem:[%s2718_s3 + $0xf0] sm:$0xff]  ;;  %v1723_v52 = vld [vmem:[%s2718_s3 + $0xe8] sm:$0xf] }
 0x140   :  { %v1145_v7 = vrot.slane %v309_v58, 1  ;;  %v1228_v8 = vrot.slane %v309_v58, 2  ;;  %v1311_v9 = vrot.slane %v309_v58, 3  ;;  %v1394_v10 = vrot.slane %v309_v58, 4  ;;  %v1731_v54 = vld [vmem:[%s2718_s3 + $0x108] sm:$0xff]  ;;  %v1732_v55 = vld [vmem:[%s2718_s3 + $0x110] sm:$0xff] }
 0x141   :  { %1915 = vmatpush3.msk.msra.mxu1 %vm325_vm4, %v312_v62  ;;  %v1561_v11 = vsel %vm320_vm6, %v1560_v3, %v1559_v44  ;;  %v2482_v12 = vsel %vm320_vm6, %v980_v5, %v2446_v28  ;;  %v1477_v14 = vrot.slane %v309_v58, 5  ;;  %v1693_v28 = vld [vmem:[%s2718_s3 + $0x58] sm:$0xf]  ;;  %v2097_v37 = vpack.c.bf16 %v1707_v35, %v1706_v34  ;;  %v1728_v56 = vld [vmem:[%s2718_s3 + $0x100] sm:$0xf] }
 0x142   :  { %1917 = vmatmul.mubr.msk.f32.vlgmr.msra.gmra.mrb[2].mxu1 %vm322_vm7, %v400_v59  ;;  %2084 = vmatprep.subr.bf16.mxu1 %v2156_v19  ;;  %v2494_v17 = vsel %vm320_vm6, %v1145_v7, %v1144_v46  ;;  %v2497_v18 = vsel %vm320_vm6, %v1228_v8, %v1227_v47  ;;  %v2500_v21 = vsel %vm320_vm6, %v1311_v9, %v1310_v48  ;;  %v1713_v44 = vld [vmem:[%s2718_s3 + $0xb8] sm:$0xf]  ;;  %v1722_v47 = vld [vmem:[%s2718_s3 + $0xe0] sm:$0xff]  ;;  %v1718_v48 = vld [vmem:[%s2718_s3 + $0xd0] sm:$0xf] }
 0x143   :  { %2086 = vmatpush3.bf16.msra.mxu1 %v2085_v33  ;;  %2043 = vmatmul.mubr.msk.f32.vlgmr.msra.gmra.mrb[32].mxu0 %vm322_vm7, %v1561_v11  ;;  %v2504_v22 = vsel %vm320_vm6, %v1394_v10, %v1393_v49  ;;  %v2507_v23 = vsel %vm320_vm6, %v1477_v14, %v1476_v13  ;;  %v2094_v33 = vpack.c.bf16 %v1702_v31, %v1701_v30  ;;  %v1721_v46 = vld [vmem:[%s2718_s3 + $0xd8] sm:$0xff]  ;;  %v1736_v58 = vld [vmem:[%s2718_s3 + $0x120] sm:$0xff]  ;;  %v1737_v59 = vld [vmem:[%s2718_s3 + $0x128] sm:$0xff] }
 0x144   :  { %1923 = vmatprep.subr.mxu1 %v2157_v20  ;;  %1925 = vmatprep.mubr.msk.f32.mxu1 %vm2158_vm5, %v2157_v20  ;;  %v2100_v41 = vpack.c.bf16 %v1712_v39, %v1711_v38  ;;  %v2103_v45 = vpack.c.bf16 %v1717_v43, %v1716_v42  ;;  %v2106_v49 = vpack.c.bf16 %v1722_v47, %v1721_v46  ;;  %v1741_v62 = vld [vmem:[%s2718_s3 + $0x138] sm:$0xff] }
 0x145   :  { %v2109_v53 = vpack.c.bf16 %v1727_v51, %v1726_v50  ;;  %v2112_v57 = vpack.c.bf16 %v1732_v55, %v1731_v54  ;;  %v2115_v61 = vpack.c.bf16 %v1737_v59, %v1736_v58  ;;  %v1747_v3 = vld [vmem:[%s2718_s3 + $0x158] sm:$0xff] }
 0x147   :  { %1924 = vmatpush3.msk.msra.mxu1 %vm325_vm4, %v1688_v24 }
 0x148   :  { %1926 = vmatmul.mubr.msk.f32.vlgmr.msra.gmra.mrb[4].mxu1 %vm322_vm7, %v482_v60  ;;  %2087 = vmatprep.subr.bf16.mxu1 %v2156_v19  ;;  %v1733_v60 = vld [vmem:[%s2718_s3 + $0x118] sm:$0xf] }
 0x149   :  { %2089 = vmatpush3.bf16.msra.mxu1 %v2088_v25  ;;  %1934 = vmatprep.mubr.msk.f32.mxu1 %vm2158_vm5, %v2157_v20 }
 0x14a   :  { %1932 = vmatprep.subr.mxu1 %v2157_v20 }
 0x14d   :  { %1933 = vmatpush3.msk.msra.mxu1 %vm325_vm4, %v1693_v28 }
 0x14e   :  { %1935 = vmatmul.mubr.msk.f32.vlgmr.msra.gmra.mrb[6].mxu1 %vm322_vm7, %v565_v63  ;;  %2090 = vmatprep.subr.bf16.mxu1 %v2156_v19  ;;  %v1742_v63 = vld [vmem:[%s2718_s3 + $0x140] sm:$0xff] }
 0x14f   :  { %2092 = vmatpush3.bf16.msra.mxu1 %v2091_v29  ;;  %1943 = vmatprep.mubr.msk.f32.mxu1 %vm2158_vm5, %v2157_v20 }
 0x150   :  { %1941 = vmatprep.subr.mxu1 %v2157_v20 }
 0x153   :  { %1942 = vmatpush3.msk.msra.mxu1 %vm325_vm4, %v1698_v32 }
 0x154   :  { %1944 = vmatmul.mubr.msk.f32.vlgmr.msra.gmra.mrb[8].mxu1 %vm322_vm7, %v648_v0  ;;  %2093 = vmatprep.subr.bf16.mxu1 %v2156_v19  ;;  %v1738_v0 = vld [vmem:[%s2718_s3 + $0x130] sm:$0xf] }
 0x155   :  { %2095 = vmatpush3.bf16.msra.mxu1 %v2094_v33  ;;  %1952 = vmatprep.mubr.msk.f32.mxu1 %vm2158_vm5, %v2157_v20 }
 0x156   :  { %1950 = vmatprep.subr.mxu1 %v2157_v20 }
 0x159   :  { %1951 = vmatpush3.msk.msra.mxu1 %vm325_vm4, %v1703_v36 }
 0x15a   :  { %1953 = vmatmul.mubr.msk.f32.vlgmr.msra.gmra.mrb[10].mxu1 %vm322_vm7, %v731_v1  ;;  %2096 = vmatprep.subr.bf16.mxu1 %v2156_v19  ;;  %v2118_v1 = vpack.c.bf16 %v1742_v63, %v1741_v62 }
 0x15b   :  { %2098 = vmatpush3.bf16.msra.mxu1 %v2097_v37  ;;  %1961 = vmatprep.mubr.msk.f32.mxu1 %vm2158_vm5, %v2157_v20 }
 0x15c   :  { %1959 = vmatprep.subr.mxu1 %v2157_v20 }
 0x15f   :  { %1960 = vmatpush3.msk.msra.mxu1 %vm325_vm4, %v1708_v40 }
 0x160   :  { %1962 = vmatmul.mubr.msk.f32.vlgmr.msra.gmra.mrb[12].mxu1 %vm322_vm7, %v2470_v2  ;;  %2099 = vmatprep.subr.bf16.mxu1 %v2156_v19  ;;  %v1746_v2 = vld [vmem:[%s2718_s3 + $0x150] sm:$0xff] }
 0x161   :  { %2101 = vmatpush3.bf16.msra.mxu1 %v2100_v41  ;;  %1970 = vmatprep.mubr.msk.f32.mxu1 %vm2158_vm5, %v2157_v20  ;;  %v2121_v5 = vpack.c.bf16 %v1747_v3, %v1746_v2 }
 0x162   :  { %1968 = vmatprep.subr.mxu1 %v2157_v20 }
 0x165   :  { %1969 = vmatpush3.msk.msra.mxu1 %vm325_vm4, %v1713_v44 }
 0x166   :  { %1971 = vmatmul.mubr.msk.f32.vlgmr.msra.gmra.mrb[14].mxu1 %vm322_vm7, %v2473_v4  ;;  %2102 = vmatprep.subr.bf16.mxu1 %v2156_v19  ;;  %v1743_v4 = vld [vmem:[%s2718_s3 + $0x148] sm:$0xf] }
 0x167   :  { %2104 = vmatpush3.bf16.msra.mxu1 %v2103_v45  ;;  %1979 = vmatprep.mubr.msk.f32.mxu1 %vm2158_vm5, %v2157_v20 }
 0x168   :  { %1977 = vmatprep.subr.mxu1 %v2157_v20 }
 0x16b   :  { %1978 = vmatpush3.msk.msra.mxu1 %vm325_vm4, %v1718_v48 }
 0x16c   :  { %1980 = vmatmul.mubr.msk.f32.vlgmr.msra.gmra.mrb[16].mxu1 %vm322_vm7, %v2482_v12  ;;  %2105 = vmatprep.subr.bf16.mxu1 %v2156_v19 }
 0x16d   :  { %2107 = vmatpush3.bf16.msra.mxu1 %v2106_v49  ;;  %1988 = vmatprep.mubr.msk.f32.mxu1 %vm2158_vm5, %v2157_v20 }
 0x16e   :  { %1986 = vmatprep.subr.mxu1 %v2157_v20 }
 0x171   :  { %1987 = vmatpush3.msk.msra.mxu1 %vm325_vm4, %v1723_v52 }
 0x172   :  { %1989 = vmatmul.mubr.msk.f32.vlgmr.msra.gmra.mrb[18].mxu1 %vm322_vm7, %v2476_v6  ;;  %2108 = vmatprep.subr.bf16.mxu1 %v2156_v19  ;;  %v1748_v6 = vld [vmem:[%s2718_s3 + $0x160] sm:$0xf] }
 0x173   :  { %2110 = vmatpush3.bf16.msra.mxu1 %v2109_v53  ;;  %1997 = vmatprep.mubr.msk.f32.mxu1 %vm2158_vm5, %v2157_v20  ;;  %v1756_v53 = vld [vmem:[%s2719_s4] ss:$0 sm:$0xff] }
 0x174   :  { %1995 = vmatprep.subr.mxu1 %v2157_v20 }
 0x177   :  { %1996 = vmatpush3.msk.msra.mxu1 %vm325_vm4, %v1728_v56 }
 0x178   :  { %1998 = vmatmul.mubr.msk.f32.vlgmr.msra.gmra.mrb[20].mxu1 %vm322_vm7, %v2494_v17  ;;  %2111 = vmatprep.subr.bf16.mxu1 %v2156_v19 }
 0x179   :  { %2113 = vmatpush3.bf16.msra.mxu1 %v2112_v57  ;;  %2006 = vmatprep.mubr.msk.f32.mxu1 %vm2158_vm5, %v2157_v20 }
 0x17a   :  { %2004 = vmatprep.subr.mxu1 %v2157_v20 }
 0x17d   :  { %2005 = vmatpush3.msk.msra.mxu1 %vm325_vm4, %v1733_v60 }
 0x17e   :  { %2007 = vmatmul.mubr.msk.f32.vlgmr.msra.gmra.mrb[22].mxu1 %vm322_vm7, %v2497_v18  ;;  %2114 = vmatprep.subr.bf16.mxu1 %v2156_v19 }
 0x17f   :  { %2116 = vmatpush3.bf16.msra.mxu1 %v2115_v61  ;;  %2015 = vmatprep.mubr.msk.f32.mxu1 %vm2158_vm5, %v2157_v20 }
 0x180   :  { %2013 = vmatprep.subr.mxu1 %v2157_v20 }
 0x183   :  { %2014 = vmatpush3.msk.msra.mxu1 %vm325_vm4, %v1738_v0 }
 0x184   :  { %2016 = vmatmul.mubr.msk.f32.vlgmr.msra.gmra.mrb[24].mxu1 %vm322_vm7, %v2500_v21  ;;  %2117 = vmatprep.subr.bf16.mxu1 %v2156_v19 }
 0x185   :  { %2119 = vmatpush3.bf16.msra.mxu1 %v2118_v1  ;;  %2024 = vmatprep.mubr.msk.f32.mxu1 %vm2158_vm5, %v2157_v20 }
 0x186   :  { %2022 = vmatprep.subr.mxu1 %v2157_v20 }
 0x189   :  { %2023 = vmatpush3.msk.msra.mxu1 %vm325_vm4, %v1743_v4 }
 0x18a   :  { %2025 = vmatmul.mubr.msk.f32.vlgmr.msra.gmra.mrb[26].mxu1 %vm322_vm7, %v2504_v22  ;;  %2120 = vmatprep.subr.bf16.mxu1 %v2156_v19 }
 0x18b   :  { %2122 = vmatpush3.bf16.msra.mxu1 %v2121_v5  ;;  %2033 = vmatprep.mubr.msk.f32.mxu1 %vm2158_vm5, %v2157_v20 }
 0x18c   :  { %2031 = vmatprep.subr.mxu1 %v2157_v20 }
 0x18f   :  { %2032 = vmatpush3.msk.msra.mxu1 %vm325_vm4, %v1748_v6 }
 0x190   :  { %2034 = vmatmul.mubr.msk.f32.vlgmr.msra.gmra.mrb[28].mxu1 %vm322_vm7, %v2507_v23 }
 0x20f   :  { %v395_v7 = vpop.f32.mrb[0].mxu1 }
 0x210   :  { %v1909_v8 = vpop.f32.mrb[1].mxu1 }
 0x215   :  { %v472_v9 = vpop.f32.mrb[2].mxu1 }
 0x216   :  { %v473_v10 = vadd.f32 %v472_v9, %v395_v7  ;;  %v1918_v19 = vpop.f32.mrb[3].mxu1  ;;  %v1633_v11 = vpop.f32.mrb[32].mxu0 }
 0x217   :  { %v2044_v12 = vpop.f32.mrb[33].mxu0 }
 0x21b   :  { %v554_v13 = vpop.f32.mrb[4].mxu1 }
 0x21c   :  { %v558_v14 = vadd.f32 %v554_v13, %v473_v10  ;;  %v1927_v15 = vpop.f32.mrb[5].mxu1 }
 0x221   :  { %v637_v20 = vpop.f32.mrb[6].mxu1 }
 0x222   :  { %v641_v16 = vadd.f32 %v637_v20, %v558_v14  ;;  %v1936_v17 = vpop.f32.mrb[7].mxu1 }
 0x227   :  { %v720_v18 = vpop.f32.mrb[8].mxu1 }
 0x228   :  { %v724_v21 = vadd.f32 %v720_v18, %v641_v16  ;;  %v1945_v22 = vpop.f32.mrb[9].mxu1 }
 0x22d   :  { %v803_v24 = vpop.f32.mrb[10].mxu1 }
 0x22e   :  { %v807_v25 = vadd.f32 %v803_v24, %v724_v21  ;;  %v1954_v26 = vpop.f32.mrb[11].mxu1 }
 0x233   :  { %v886_v23 = vpop.f32.mrb[12].mxu1 }
 0x234   :  { %v890_v27 = vadd.f32 %v886_v23, %v807_v25  ;;  %v1963_v28 = vpop.f32.mrb[13].mxu1 }
 0x239   :  { %v969_v29 = vpop.f32.mrb[14].mxu1 }
 0x23a   :  { %v973_v30 = vadd.f32 %v969_v29, %v890_v27  ;;  %v1972_v31 = vpop.f32.mrb[15].mxu1 }
 0x23f   :  { %v1053_v32 = vpop.f32.mrb[16].mxu1 }
 0x240   :  { %v1057_v33 = vadd.f32 %v1053_v32, %v973_v30  ;;  %v1981_v34 = vpop.f32.mrb[17].mxu1 }
 0x245   :  { %v1135_v35 = vpop.f32.mrb[18].mxu1 }
 0x246   :  { %v1139_v36 = vadd.f32 %v1135_v35, %v1057_v33  ;;  %v1990_v37 = vpop.f32.mrb[19].mxu1 }
 0x24b   :  { %v1218_v38 = vpop.f32.mrb[20].mxu1 }
 0x24c   :  { %v1222_v39 = vadd.f32 %v1218_v38, %v1139_v36  ;;  %v1999_v40 = vpop.f32.mrb[21].mxu1 }
 0x251   :  { %v1301_v41 = vpop.f32.mrb[22].mxu1 }
 0x252   :  { %v1305_v42 = vadd.f32 %v1301_v41, %v1222_v39  ;;  %v2008_v43 = vpop.f32.mrb[23].mxu1 }
 0x257   :  { %v1384_v44 = vpop.f32.mrb[24].mxu1 }
 0x258   :  { %v1388_v45 = vadd.f32 %v1384_v44, %v1305_v42  ;;  %v2017_v46 = vpop.f32.mrb[25].mxu1 }
 0x25d   :  { %v1467_v47 = vpop.f32.mrb[26].mxu1 }
 0x25e   :  { %v1471_v48 = vadd.f32 %v1467_v47, %v1388_v45  ;;  %v2026_v49 = vpop.f32.mrb[27].mxu1 }
 0x263   :  { %v1550_v50 = vpop.f32.mrb[28].mxu1 }
 0x264   :  { %v1554_v51 = vadd.f32 %v1550_v50, %v1471_v48  ;;  %v2035_v52 = vpop.f32.mrb[29].mxu1 }
 0x266   :  { %v1637_v54 = vadd.f32 %v1633_v11, %v1554_v51 }
 0x268   :  { %v1645_v55 = vadd.f32 %v1756_v53, %v1637_v54 }
 0x26a   :  { %1646 = vst [vmem:[#allocation2] sm:$0x3] %v1645_v55 }
 0x26b   :  { %2142 = shalt.err (!%p2139_p4)
}
 0x26c   :  { %s2143_s11 = scalar_lea.hbm %s2720_s5, 32 }
 0x26d   :  { %p2144_p5 = scmp.ne.s32.totalorder %s2720_s5, %s2143_s11  ;;  %p2147_p6 = scmp.lt.u32.totalorder %s2143_s11, %s2720_s5 }
 0x26f   :  { %p2149_p7 = pnand %p2147_p6, %p2144_p5 }
 0x271   :  { %2152 = shalt.err (!%p2149_p7)
}
 0x272   :  { %1656 = dma.vmem_to_hbm [thread:$0]  %s1654_s8, 32, %s2720_s5, [#allocation3]  }
 0x273   :  { %2153 = dma.done.wait [#allocation3], 32  }
 0x274   :  { %2154 = vsyncadd [#allocation3], 4294967264 }
 0x275   :  { %1660 = vsyncpa [#allocation3], 1 }

</bundles_post_ra>
